<compile_context>
chip_gen: v6e
topology: v6e:2x2x1
jax: 0.10.0
libtpu: 0.0.40
codegen_flags: <defaults>
</compile_context>

<pallas_src>
import functools
import numpy as np
import jax
import jax.numpy as jnp
from jax import lax
from jax.experimental import pallas as pl
from jax.experimental.pallas import tpu as pltpu

# Full-f32 precision for all XLA dots (reference path + any wrapper ops) so the
# Pallas path and the pure-JAX reference agree to ~1e-5.
jax.config.update("jax_default_matmul_precision", "highest")


def _vmem_limit_bytes():
    """Derive the scoped-VMEM limit from the hardware (perf review) with a
    conservative fallback that is safe on v5e/v6e/v7x."""
    try:
        info = pltpu.get_tpu_info()
        cap = getattr(info, "vmem_capacity_bytes", None)
        if cap:
            return int(min(100 * 1024 * 1024, (int(cap) * 3) // 4))
    except Exception:
        pass
    return 32 * 1024 * 1024


# ---------------------------------------------------------------------------
# Kernel 1: fused QKV projection (one HBM pass over x, three separate outputs)
# ---------------------------------------------------------------------------
def _qkv_kernel(x_ref, w_ref, b_ref, q_ref, k_ref, v_ref):
    # x: (tm, Din)   w: (Din, 3D) resident   b: (1, 3D)
    acc = jnp.dot(x_ref[...], w_ref[...], preferred_element_type=jnp.float32)
    acc = acc + b_ref[...]
    D = q_ref.shape[1]
    q_ref[...] = acc[:, :D].astype(q_ref.dtype)
    k_ref[...] = acc[:, D:2 * D].astype(k_ref.dtype)
    v_ref[...] = acc[:, 2 * D:].astype(v_ref.dtype)


def qkv_projection_pallas(x2d, w_qkv, b_qkv, *, tile_m=512):
    """q, k, v = split(x2d @ w_qkv + b_qkv).  RoPE + 1/sqrt(d_k) are already
    folded into the Q/K columns of w_qkv/b_qkv."""
    M, Din = x2d.shape
    D3 = w_qkv.shape[1]
    D = D3 // 3
    tm = M if M <= tile_m else tile_m
    b2d = b_qkv.reshape(1, D3)
    out_sd = jax.ShapeDtypeStruct((M, D), x2d.dtype)
    # TODO(synk): add a Dout grid axis (tile the weight) once 24*D^2 bytes of
    # double-buffered resident weight no longer fits the VMEM budget.
    return pl.pallas_call(
        _qkv_kernel,
        out_shape=(out_sd, out_sd, out_sd),
        grid=(pl.cdiv(M, tm),),
        in_specs=[
            pl.BlockSpec((tm, Din), lambda i: (i, 0)),
            pl.BlockSpec((Din, D3), lambda i: (0, 0)),   # weight resident
            pl.BlockSpec((1, D3), lambda i: (0, 0)),
        ],
        out_specs=(
            pl.BlockSpec((tm, D), lambda i: (i, 0)),
            pl.BlockSpec((tm, D), lambda i: (i, 0)),
            pl.BlockSpec((tm, D), lambda i: (i, 0)),
        ),
        compiler_params=pltpu.CompilerParams(
            dimension_semantics=("parallel",),
            vmem_limit_bytes=_vmem_limit_bytes()),
    )(x2d, w_qkv, b2d)


# ---------------------------------------------------------------------------
# Kernel 2: attention (all heads of one batch per step) + fused Wo epilogue
# ---------------------------------------------------------------------------
def _attn_wo_kernel(q_ref, k_ref, v_ref, wo_ref, bo_ref, y_ref, *, mask):
    # q: (1, H, TQ, d_k)  k/v: (1, H, T, d_k)  wo: (H, d_k, D)  bo: (1, D)
    # y: (1, TQ, D) -- final module output rows (lane-dense single store).
    q = q_ref[0]                       # (H, TQ, d_k), pre-scaled & RoPE'd
    k = k_ref[0]                       # (H, T,  d_k), RoPE'd
    v = v_ref[0]                       # (H, T,  d_k)
    H, TQ, d_k = q.shape
    T = k.shape[1]

    # scores, contracting the last dim (no k.T relayout)
    s = jnp.einsum("hqd,hkd->hqk", q, k, preferred_element_type=jnp.float32)

    if mask != "none":
        q0 = pl.program_id(1) * TQ
        row = q0 + lax.broadcasted_iota(jnp.int32, (TQ, T), 0)
        col = lax.broadcasted_iota(jnp.int32, (TQ, T), 1)
        if mask == "upper":
            s = jnp.where(col > row, jnp.float32(-1e9), s)
        else:  # "lower"
            s = jnp.where(col < row, jnp.float32(-1e9), s)

    # softmax numerator + row sums; normalization deferred past the PV matmul
    s = s - jnp.max(s, axis=-1, keepdims=True)
    p = jnp.exp(s)
    denom = jnp.sum(p, axis=-1, keepdims=True)                 # (H, TQ, 1)

    o = jnp.einsum("hqk,hkd->hqd", p, v, preferred_element_type=jnp.float32)
    o = o * pl.reciprocal(denom, approx=False)                 # exact; (H,TQ,d_k)

    # Fused output projection: out = concat_h(o_h) @ Wo + b, computed as
    # sum_h o_h @ Wo[h]. Avoids any in-kernel head-concat relayout and yields a
    # single lane-dense (TQ, D) store.
    wo = wo_ref[...]                                           # (H, d_k, D)
    out = jnp.zeros((TQ, wo.shape[2]), jnp.float32)
    for h in range(H):
        out = out + jnp.dot(o[h], wo[h], preferred_element_type=jnp.float32)
    y_ref[0] = (out + bo_ref[...]).astype(y_ref.dtype)


def attention_output_pallas(q, k, v, wo3, wo_b, *, mask="none", tile_q=256):
    """q/k/v: (B, H, T, d_k) (the reference's raw-view layout).  Returns the
    final module output (B, T, D) = softmax(qk^T)v rearranged + Wo projection."""
    B, H, T, d_k = q.shape
    D = H * d_k
    TQ = T if T <= tile_q else tile_q
    bo2d = wo_b.reshape(1, D)
    kernel = functools.partial(_attn_wo_kernel, mask=mask)
    # TODO(synk): for large T switch to flash-style KV tiling (kv axis last,
    # "arbitrary", m/l/acc scratch) so the (H,TQ,T) score block stays bounded.
    return pl.pallas_call(
        kernel,
        out_shape=jax.ShapeDtypeStruct((B, T, D), q.dtype),
        grid=(B, pl.cdiv(T, TQ)),
        in_specs=[
            pl.BlockSpec((1, H, TQ, d_k), lambda b, qi: (b, 0, qi, 0)),
            pl.BlockSpec((1, H, T, d_k), lambda b, qi: (b, 0, 0, 0)),
            pl.BlockSpec((1, H, T, d_k), lambda b, qi: (b, 0, 0, 0)),
            pl.BlockSpec((H, d_k, D), lambda b, qi: (0, 0, 0)),   # Wo resident
            pl.BlockSpec((1, D), lambda b, qi: (0, 0)),
        ],
        out_specs=pl.BlockSpec((1, TQ, D), lambda b, qi: (b, qi, 0)),
        compiler_params=pltpu.CompilerParams(
            # Shard only the batch axis across cores so each core keeps K/V
            # reuse across query tiles (matters on v7x's 2 TCs).
            dimension_semantics=("parallel", "arbitrary"),
            vmem_limit_bytes=_vmem_limit_bytes()),
    )(q, k, v, wo3, bo2d)


# ---------------------------------------------------------------------------
# RoPE (position-independent quirk of the reference) + exact elementwise fold
# ---------------------------------------------------------------------------
def _rope_vectors(seq_len, d_k):
    # Reference: theta_base=10000; the single position index used is `seq_len`.
    power = np.arange(d_k // 2, dtype=np.float32) * (-2.0 / d_k)
    theta = np.power(np.float32(10000.0), power)               # (d_k/2,)
    angle = np.repeat(np.float32(seq_len) * theta, 2)          # (d_k,)
    return np.cos(angle).astype(np.float32), np.sin(angle).astype(np.float32)


def _apply_rope_to_last_dim(w, cos_vec, sin_vec, num_heads, d_k):
    """Apply the reference RoPE rotation to the last axis of `w` independently
    per d_k chunk.  Purely elementwise -> exact (no matmul precision issues)."""
    lead = w.shape[:-1]
    wh = w.reshape(lead + (num_heads, d_k))
    pairs = wh.reshape(lead + (num_heads, d_k // 2, 2))
    # out[2j] = -x[2j+1], out[2j+1] = x[2j]   (== reference get_sin_weight)
    rotated = jnp.stack([-pairs[..., 1], pairs[..., 0]], axis=-1)
    rotated = rotated.reshape(lead + (num_heads, d_k))
    out = wh * jnp.asarray(cos_vec) + rotated * jnp.asarray(sin_vec)
    return out.reshape(w.shape)


def prepare_mhsa_params(params, num_heads, seq_len):
    """Once-per-(weights, seq_len) preparation, hoisted OUT of the jitted
    forward (perf review).  Folds RoPE + the 1/sqrt(d_k) score scale into the
    Q/K projection, concatenates QKV, reshapes Wo per head."""
    D = params["wq_w"].shape[0]
    d_k = D // num_heads
    scale = 1.0 / float(np.sqrt(d_k))
    cos_vec, sin_vec = _rope_vectors(seq_len, d_k)

    wq_t = params["wq_w"].T            # (Din, D); y = x @ W.T + b
    wk_t = params["wk_w"].T
    wv_t = params["wv_w"].T

    wq_eff = _apply_rope_to_last_dim(wq_t, cos_vec, sin_vec, num_heads, d_k) * scale
    bq_eff = _apply_rope_to_last_dim(params["wq_b"], cos_vec, sin_vec, num_heads, d_k) * scale
    wk_eff = _apply_rope_to_last_dim(wk_t, cos_vec, sin_vec, num_heads, d_k)
    bk_eff = _apply_rope_to_last_dim(params["wk_b"], cos_vec, sin_vec, num_heads, d_k)

    w_qkv = jnp.concatenate([wq_eff, wk_eff, wv_t], axis=1)          # (D, 3D)
    b_qkv = jnp.concatenate([bq_eff, bk_eff, params["wv_b"]])        # (3D,)
    wo3 = params["wo_w"].T.reshape(num_heads, d_k, D)                # (H, d_k, D)
    return {"w_qkv": w_qkv, "b_qkv": b_qkv, "wo3": wo3, "wo_b": params["wo_b"]}


# ---------------------------------------------------------------------------
# Module forward (glue in plain JAX, hot paths in Pallas)
# ---------------------------------------------------------------------------
def multi_head_self_attention(x, prepared, num_heads, mask="none"):
    B, T, D = x.shape
    d_k = D // num_heads
    x2d = x.reshape(B * T, D)

    q2d, k2d, v2d = qkv_projection_pallas(x2d, prepared["w_qkv"], prepared["b_qkv"])

    # PyTorch .view(B, H, T, d_k) on contiguous (B, T, D) = raw reinterpretation
    # (free reshape here; no HBM copy).
    xq = q2d.reshape(B, num_heads, T, d_k)
    xk = k2d.reshape(B, num_heads, T, d_k)
    xv = v2d.reshape(B, num_heads, T, d_k)

    # TODO(synk): dropout with p=0.0 is the identity (eval semantics).
    return attention_output_pallas(xq, xk, xv, prepared["wo3"], prepared["wo_b"],
                                   mask=mask)


# ---------------------------------------------------------------------------
# Pure-JAX reference (unfused, mirrors the PyTorch module) for verification
# ---------------------------------------------------------------------------
def reference_jax(x, params, num_heads, mask="none"):
    B, T, D = x.shape
    d_k = D // num_heads

    def lin(a, w, b):
        return a @ w.T + b

    xq = lin(x, params["wq_w"], params["wq_b"]).reshape(B, num_heads, T, d_k)
    xk = lin(x, params["wk_w"], params["wk_b"]).reshape(B, num_heads, T, d_k)
    xv = lin(x, params["wv_w"], params["wv_b"]).reshape(B, num_heads, T, d_k)

    cos_vec, sin_vec = _rope_vectors(T, d_k)

    def rope(v):
        pairs = v.reshape(v.shape[:-1] + (d_k // 2, 2))
        rot = jnp.stack([-pairs[..., 1], pairs[..., 0]], axis=-1).reshape(v.shape)
        return v * cos_vec + rot * sin_vec

    xq, xk = rope(xq), rope(xk)
    scores = jnp.einsum("bhtd,bhsd->bhts", xq, xk) / np.sqrt(d_k)
    if mask == "upper":
        m = jnp.triu(jnp.ones((T, T)), k=1)
        scores = jnp.where(m == 1, -1e9, scores)
    elif mask == "lower":
        m = jnp.tril(jnp.ones((T, T)), k=-1)
        scores = jnp.where(m == 1, -1e9, scores)
    p = jax.nn.softmax(scores, axis=-1)
    out = jnp.einsum("bhts,bhsd->bhtd", p, xv)
    out = jnp.transpose(out, (0, 2, 1, 3)).reshape(B, T, D)
    return lin(out, params["wo_w"], params["wo_b"])


# ---------------------------------------------------------------------------
if __name__ == "__main__":
    B, T, D, H = 2, 8, 32, 4   # batch, seq, model_dim, num_heads  (d_k = 8, even)

    key = jax.random.PRNGKey(0)
    kx, kq, kk, kv, ko, kb = jax.random.split(key, 6)
    x = jax.random.normal(kx, (B, T, D), dtype=jnp.float32)

    # Deterministic kaiming_uniform-style weights; non-zero biases to exercise
    # the bias + RoPE fold (the module inits bias=0, but trained weights won't be).
    bound = float(np.sqrt(6.0 / D))
    bq, bk, bv, bo = jax.random.split(kb, 4)
    params = {
        "wq_w": jax.random.uniform(kq, (D, D), jnp.float32, -bound, bound),
        "wk_w": jax.random.uniform(kk, (D, D), jnp.float32, -bound, bound),
        "wv_w": jax.random.uniform(kv, (D, D), jnp.float32, -bound, bound),
        "wo_w": jax.random.uniform(ko, (D, D), jnp.float32, -bound, bound),
        "wq_b": 0.1 * jax.random.normal(bq, (D,), jnp.float32),
        "wk_b": 0.1 * jax.random.normal(bk, (D,), jnp.float32),
        "wv_b": 0.1 * jax.random.normal(bv, (D,), jnp.float32),
        "wo_b": 0.1 * jax.random.normal(bo, (D,), jnp.float32),
    }

    prepared = prepare_mhsa_params(params, H, T)   # hoisted out of the jit
    mhsa = jax.jit(multi_head_self_attention, static_argnums=(2, 3))

    for mask in ("none", "upper", "lower"):
        out = jax.block_until_ready(mhsa(x, prepared, H, mask))
        ref = reference_jax(x, params, H, mask)
        assert out.shape == (B, T, D)
        err = float(jnp.max(jnp.abs(out - ref)))
        assert np.allclose(np.asarray(out), np.asarray(ref),
                           atol=2e-3, rtol=2e-3), (
            f"mismatch vs pure-JAX reference (mask={mask}, max abs err={err})")

    print("KERNEL_OK")
</pallas_src>

<mosaic_0001>
module attributes {stable_mosaic.version = 11 : i64} {
  func.func @_qkv_kernel(%arg0: i32, %arg1: memref<16x32xf32, #tpu.memory_space<vmem>>, %arg2: memref<32x96xf32, #tpu.memory_space<vmem>>, %arg3: memref<1x96xf32, #tpu.memory_space<vmem>>, %arg4: memref<16x32xf32, #tpu.memory_space<vmem>>, %arg5: memref<16x32xf32, #tpu.memory_space<vmem>>, %arg6: memref<16x32xf32, #tpu.memory_space<vmem>>) attributes {dimension_semantics = [#tpu.dimension_semantics<parallel>], iteration_bounds = array<i64: 1>, scalar_prefetch = 0 : i64, scratch_operands = 0 : i64, tpu.core_type = #tpu.core_type<tc>, window_params = [{transform_indices = @transform_0, window_bounds = array<i64: 16, 32>}, {pipeline_mode = #tpu.pipeline_mode<synchronous>, transform_indices = @transform_1, window_bounds = array<i64: 32, 96>}, {pipeline_mode = #tpu.pipeline_mode<synchronous>, transform_indices = @transform_2, window_bounds = array<i64: 1, 96>}, {transform_indices = @transform_3, window_bounds = array<i64: 16, 32>}, {transform_indices = @transform_4, window_bounds = array<i64: 16, 32>}, {transform_indices = @transform_5, window_bounds = array<i64: 16, 32>}]} {
    %c0 = arith.constant 0 : index
    %c0_0 = arith.constant 0 : index
    %0 = vector.load %arg1[%c0, %c0_0] : memref<16x32xf32, #tpu.memory_space<vmem>>, vector<16x32xf32>
    %c0_1 = arith.constant 0 : index
    %c0_2 = arith.constant 0 : index
    %1 = vector.load %arg2[%c0_1, %c0_2] : memref<32x96xf32, #tpu.memory_space<vmem>>, vector<32x96xf32>
    %cst = arith.constant dense<0.000000e+00> : vector<16x96xf32>
    %2 = tpu.matmul %0, %1, %cst {dimension_numbers = #tpu.dot_dimension_numbers<[1], [0], [0], [1], [0, 0, 1, 1], [], []>, precision = #tpu.contract_precision<fp32>} : vector<16x32xf32>, vector<32x96xf32>, vector<16x96xf32> -> vector<16x96xf32>
    %c0_3 = arith.constant 0 : index
    %c0_4 = arith.constant 0 : index
    %3 = vector.load %arg3[%c0_3, %c0_4] : memref<1x96xf32, #tpu.memory_space<vmem>>, vector<1x96xf32>
    %4 = vector.broadcast %3 : vector<1x96xf32> to vector<16x96xf32>
    %5 = arith.addf %2, %4 : vector<16x96xf32>
    %6 = vector.extract_strided_slice %5 {offsets = [0, 0], sizes = [16, 32], strides = [1, 1]} : vector<16x96xf32> to vector<16x32xf32>
    %c0_5 = arith.constant 0 : index
    %c0_6 = arith.constant 0 : index
    %7 = vector.load %arg4[%c0_5, %c0_6] : memref<16x32xf32, #tpu.memory_space<vmem>>, vector<16x32xf32>
    tpu.vector_store %arg4[%c0_5, %c0_6], %6 {strides = array<i32>} : memref<16x32xf32, #tpu.memory_space<vmem>>, vector<16x32xf32>,
    %8 = vector.extract_strided_slice %5 {offsets = [0, 32], sizes = [16, 32], strides = [1, 1]} : vector<16x96xf32> to vector<16x32xf32>
    %c0_7 = arith.constant 0 : index
    %c0_8 = arith.constant 0 : index
    %9 = vector.load %arg5[%c0_7, %c0_8] : memref<16x32xf32, #tpu.memory_space<vmem>>, vector<16x32xf32>
    tpu.vector_store %arg5[%c0_7, %c0_8], %8 {strides = array<i32>} : memref<16x32xf32, #tpu.memory_space<vmem>>, vector<16x32xf32>,
    %10 = vector.extract_strided_slice %5 {offsets = [0, 64], sizes = [16, 32], strides = [1, 1]} : vector<16x96xf32> to vector<16x32xf32>
    %c0_9 = arith.constant 0 : index
    %c0_10 = arith.constant 0 : index
    %11 = vector.load %arg6[%c0_9, %c0_10] : memref<16x32xf32, #tpu.memory_space<vmem>>, vector<16x32xf32>
    tpu.vector_store %arg6[%c0_9, %c0_10], %10 {strides = array<i32>} : memref<16x32xf32, #tpu.memory_space<vmem>>, vector<16x32xf32>,
    return
  }
  func.func @transform_0(%arg0: i32) -> (i32, i32) {
    %c0_i32 = arith.constant 0 : i32
    %c0_i32_0 = arith.constant 0 : i32
    return %arg0, %c0_i32 : i32, i32
  }
  func.func @transform_1(%arg0: i32) -> (i32, i32) {
    %c0_i32 = arith.constant 0 : i32
    %c0_i32_0 = arith.constant 0 : i32
    %c0_i32_1 = arith.constant 0 : i32
    return %c0_i32, %c0_i32_0 : i32, i32
  }
  func.func @transform_2(%arg0: i32) -> (i32, i32) {
    %c0_i32 = arith.constant 0 : i32
    %c0_i32_0 = arith.constant 0 : i32
    %c0_i32_1 = arith.constant 0 : i32
    return %c0_i32, %c0_i32_0 : i32, i32
  }
  func.func @transform_3(%arg0: i32) -> (i32, i32) {
    %c0_i32 = arith.constant 0 : i32
    %c0_i32_0 = arith.constant 0 : i32
    return %arg0, %c0_i32 : i32, i32
  }
  func.func @transform_4(%arg0: i32) -> (i32, i32) {
    %c0_i32 = arith.constant 0 : i32
    %c0_i32_0 = arith.constant 0 : i32
    return %arg0, %c0_i32 : i32, i32
  }
  func.func @transform_5(%arg0: i32) -> (i32, i32) {
    %c0_i32 = arith.constant 0 : i32
    %c0_i32_0 = arith.constant 0 : i32
    return %arg0, %c0_i32 : i32, i32
  }
}

module attributes {stable_mosaic.version = 11 : i64} {
  func.func @_attn_wo_kernel(%arg0: i32, %arg1: i32, %arg2: memref<1x4x8x8xf32, #tpu.memory_space<vmem>>, %arg3: memref<1x4x8x8xf32, #tpu.memory_space<vmem>>, %arg4: memref<1x4x8x8xf32, #tpu.memory_space<vmem>>, %arg5: memref<4x8x32xf32, #tpu.memory_space<vmem>>, %arg6: memref<1x32xf32, #tpu.memory_space<vmem>>, %arg7: memref<1x8x32xf32, #tpu.memory_space<vmem>>) attributes {dimension_semantics = [#tpu.dimension_semantics<parallel>, #tpu.dimension_semantics<arbitrary>], iteration_bounds = array<i64: 2, 1>, scalar_prefetch = 0 : i64, scratch_operands = 0 : i64, tpu.core_type = #tpu.core_type<tc>, window_params = [{transform_indices = @transform_0, window_bounds = array<i64: 1, 4, 8, 8>}, {transform_indices = @transform_1, window_bounds = array<i64: 1, 4, 8, 8>}, {transform_indices = @transform_2, window_bounds = array<i64: 1, 4, 8, 8>}, {pipeline_mode = #tpu.pipeline_mode<synchronous>, transform_indices = @transform_3, window_bounds = array<i64: 4, 8, 32>}, {pipeline_mode = #tpu.pipeline_mode<synchronous>, transform_indices = @transform_4, window_bounds = array<i64: 1, 32>}, {transform_indices = @transform_5, window_bounds = array<i64: 1, 8, 32>}]} {
    %c0 = arith.constant 0 : index
    %c0_0 = arith.constant 0 : index
    %c0_1 = arith.constant 0 : index
    %c0_2 = arith.constant 0 : index
    %0 = vector.load %arg2[%c0, %c0_0, %c0_1, %c0_2] : memref<1x4x8x8xf32, #tpu.memory_space<vmem>>, vector<1x4x8x8xf32>
    %1 = vector.shape_cast %0 : vector<1x4x8x8xf32> to vector<4x8x8xf32>
    %c0_3 = arith.constant 0 : index
    %c0_4 = arith.constant 0 : index
    %c0_5 = arith.constant 0 : index
    %c0_6 = arith.constant 0 : index
    %2 = vector.load %arg3[%c0_3, %c0_4, %c0_5, %c0_6] : memref<1x4x8x8xf32, #tpu.memory_space<vmem>>, vector<1x4x8x8xf32>
    %3 = vector.shape_cast %2 : vector<1x4x8x8xf32> to vector<4x8x8xf32>
    %c0_7 = arith.constant 0 : index
    %c0_8 = arith.constant 0 : index
    %c0_9 = arith.constant 0 : index
    %c0_10 = arith.constant 0 : index
    %4 = vector.load %arg4[%c0_7, %c0_8, %c0_9, %c0_10] : memref<1x4x8x8xf32, #tpu.memory_space<vmem>>, vector<1x4x8x8xf32>
    %5 = vector.shape_cast %4 : vector<1x4x8x8xf32> to vector<4x8x8xf32>
    "tpu.trace_start"() <{level = 10 : i32, message = "hqd,hkd->hqk"}> : () -> ()
    %cst = arith.constant dense<0.000000e+00> : vector<4x8x8xf32>
    %6 = tpu.matmul %1, %3, %cst {dimension_numbers = #tpu.dot_dimension_numbers<[2], [2], [1], [1], [0, 0, 0, 1, 1, 1], [0], [0]>, precision = #tpu.contract_precision<fp32>} : vector<4x8x8xf32>, vector<4x8x8xf32>, vector<4x8x8xf32> -> vector<4x8x8xf32>
    "tpu.trace_stop"() : () -> ()
    %cst_11 = arith.constant dense<0xFF800000> : vector<4x8xf32>
    %7 = vector.multi_reduction <maximumf>, %6, %cst_11 [2] : vector<4x8x8xf32> to vector<4x8xf32>
    %8 = vector.shape_cast %7 : vector<4x8xf32> to vector<4x8x1xf32>
    %9 = vector.broadcast %8 : vector<4x8x1xf32> to vector<4x8x8xf32>
    %10 = arith.subf %6, %9 : vector<4x8x8xf32>
    %11 = math.exp %10 : vector<4x8x8xf32>
    %cst_12 = arith.constant dense<0.000000e+00> : vector<4x8xf32>
    %12 = vector.multi_reduction <add>, %11, %cst_12 [2] : vector<4x8x8xf32> to vector<4x8xf32>
    %13 = vector.shape_cast %12 : vector<4x8xf32> to vector<4x8x1xf32>
    "tpu.trace_start"() <{level = 10 : i32, message = "hqk,hkd->hqd"}> : () -> ()
    %cst_13 = arith.constant dense<0.000000e+00> : vector<4x8x8xf32>
    %14 = tpu.matmul %11, %5, %cst_13 {dimension_numbers = #tpu.dot_dimension_numbers<[2], [1], [1], [2], [0, 0, 0, 1, 1, 2], [0], [0]>, precision = #tpu.contract_precision<fp32>} : vector<4x8x8xf32>, vector<4x8x8xf32>, vector<4x8x8xf32> -> vector<4x8x8xf32>
    "tpu.trace_stop"() : () -> ()
    %15 = tpu.reciprocal %13 : vector<4x8x1xf32> -> vector<4x8x1xf32>
    %16 = vector.broadcast %15 : vector<4x8x1xf32> to vector<4x8x8xf32>
    %17 = arith.mulf %14, %16 : vector<4x8x8xf32>
    %c0_14 = arith.constant 0 : index
    %c0_15 = arith.constant 0 : index
    %c0_16 = arith.constant 0 : index
    %18 = vector.load %arg5[%c0_14, %c0_15, %c0_16] : memref<4x8x32xf32, #tpu.memory_space<vmem>>, vector<4x8x32xf32>
    %cst_17 = arith.constant 0.000000e+00 : f32
    %19 = vector.broadcast %cst_17 : f32 to vector<8x32xf32>
    %20 = vector.extract_strided_slice %17 {offsets = [0, 0, 0], sizes = [1, 8, 8], strides = [1, 1, 1]} : vector<4x8x8xf32> to vector<1x8x8xf32>
    %21 = vector.shape_cast %20 : vector<1x8x8xf32> to vector<8x8xf32>
    %22 = vector.extract_strided_slice %18 {offsets = [0, 0, 0], sizes = [1, 8, 32], strides = [1, 1, 1]} : vector<4x8x32xf32> to vector<1x8x32xf32>
    %23 = vector.shape_cast %22 : vector<1x8x32xf32> to vector<8x32xf32>
    %cst_18 = arith.constant dense<0.000000e+00> : vector<8x32xf32>
    %24 = tpu.matmul %21, %23, %cst_18 {dimension_numbers = #tpu.dot_dimension_numbers<[1], [0], [0], [1], [0, 0, 1, 1], [], []>, precision = #tpu.contract_precision<fp32>} : vector<8x8xf32>, vector<8x32xf32>, vector<8x32xf32> -> vector<8x32xf32>
    %25 = arith.addf %19, %24 : vector<8x32xf32>
    %26 = vector.extract_strided_slice %17 {offsets = [1, 0, 0], sizes = [1, 8, 8], strides = [1, 1, 1]} : vector<4x8x8xf32> to vector<1x8x8xf32>
    %27 = vector.shape_cast %26 : vector<1x8x8xf32> to vector<8x8xf32>
    %28 = vector.extract_strided_slice %18 {offsets = [1, 0, 0], sizes = [1, 8, 32], strides = [1, 1, 1]} : vector<4x8x32xf32> to vector<1x8x32xf32>
    %29 = vector.shape_cast %28 : vector<1x8x32xf32> to vector<8x32xf32>
    %cst_19 = arith.constant dense<0.000000e+00> : vector<8x32xf32>
    %30 = tpu.matmul %27, %29, %cst_19 {dimension_numbers = #tpu.dot_dimension_numbers<[1], [0], [0], [1], [0, 0, 1, 1], [], []>, precision = #tpu.contract_precision<fp32>} : vector<8x8xf32>, vector<8x32xf32>, vector<8x32xf32> -> vector<8x32xf32>
    %31 = arith.addf %25, %30 : vector<8x32xf32>
    %32 = vector.extract_strided_slice %17 {offsets = [2, 0, 0], sizes = [1, 8, 8], strides = [1, 1, 1]} : vector<4x8x8xf32> to vector<1x8x8xf32>
    %33 = vector.shape_cast %32 : vector<1x8x8xf32> to vector<8x8xf32>
    %34 = vector.extract_strided_slice %18 {offsets = [2, 0, 0], sizes = [1, 8, 32], strides = [1, 1, 1]} : vector<4x8x32xf32> to vector<1x8x32xf32>
    %35 = vector.shape_cast %34 : vector<1x8x32xf32> to vector<8x32xf32>
    %cst_20 = arith.constant dense<0.000000e+00> : vector<8x32xf32>
    %36 = tpu.matmul %33, %35, %cst_20 {dimension_numbers = #tpu.dot_dimension_numbers<[1], [0], [0], [1], [0, 0, 1, 1], [], []>, precision = #tpu.contract_precision<fp32>} : vector<8x8xf32>, vector<8x32xf32>, vector<8x32xf32> -> vector<8x32xf32>
    %37 = arith.addf %31, %36 : vector<8x32xf32>
    %38 = vector.extract_strided_slice %17 {offsets = [3, 0, 0], sizes = [1, 8, 8], strides = [1, 1, 1]} : vector<4x8x8xf32> to vector<1x8x8xf32>
    %39 = vector.shape_cast %38 : vector<1x8x8xf32> to vector<8x8xf32>
    %40 = vector.extract_strided_slice %18 {offsets = [3, 0, 0], sizes = [1, 8, 32], strides = [1, 1, 1]} : vector<4x8x32xf32> to vector<1x8x32xf32>
    %41 = vector.shape_cast %40 : vector<1x8x32xf32> to vector<8x32xf32>
    %cst_21 = arith.constant dense<0.000000e+00> : vector<8x32xf32>
    %42 = tpu.matmul %39, %41, %cst_21 {dimension_numbers = #tpu.dot_dimension_numbers<[1], [0], [0], [1], [0, 0, 1, 1], [], []>, precision = #tpu.contract_precision<fp32>} : vector<8x8xf32>, vector<8x32xf32>, vector<8x32xf32> -> vector<8x32xf32>
    %43 = arith.addf %37, %42 : vector<8x32xf32>
    %c0_22 = arith.constant 0 : index
    %c0_23 = arith.constant 0 : index
    %44 = vector.load %arg6[%c0_22, %c0_23] : memref<1x32xf32, #tpu.memory_space<vmem>>, vector<1x32xf32>
    %45 = vector.broadcast %44 : vector<1x32xf32> to vector<8x32xf32>
    %46 = arith.addf %43, %45 : vector<8x32xf32>
    %c0_24 = arith.constant 0 : index
    %c0_25 = arith.constant 0 : index
    %c0_26 = arith.constant 0 : index
    %47 = vector.load %arg7[%c0_24, %c0_25, %c0_26] : memref<1x8x32xf32, #tpu.memory_space<vmem>>, vector<1x8x32xf32>
    %48 = vector.shape_cast %47 : vector<1x8x32xf32> to vector<8x32xf32>
    %49 = vector.shape_cast %46 : vector<8x32xf32> to vector<1x8x32xf32>
    tpu.vector_store %arg7[%c0_24, %c0_25, %c0_26], %49 {strides = array<i32>} : memref<1x8x32xf32, #tpu.memory_space<vmem>>, vector<1x8x32xf32>,
    return
  }
  func.func @transform_0(%arg0: i32, %arg1: i32) -> (i32, i32, i32, i32) {
    %c0_i32 = arith.constant 0 : i32
    %c0_i32_0 = arith.constant 0 : i32
    %c0_i32_1 = arith.constant 0 : i32
    return %arg0, %c0_i32, %arg1, %c0_i32_0 : i32, i32, i32, i32
  }
  func.func @transform_1(%arg0: i32, %arg1: i32) -> (i32, i32, i32, i32) {
    %c0_i32 = arith.constant 0 : i32
    %c0_i32_0 = arith.constant 0 : i32
    %c0_i32_1 = arith.constant 0 : i32
    %c0_i32_2 = arith.constant 0 : i32
    return %arg0, %c0_i32, %c0_i32_0, %c0_i32_1 : i32, i32, i32, i32
  }
  func.func @transform_2(%arg0: i32, %arg1: i32) -> (i32, i32, i32, i32) {
    %c0_i32 = arith.constant 0 : i32
    %c0_i32_0 = arith.constant 0 : i32
    %c0_i32_1 = arith.constant 0 : i32
    %c0_i32_2 = arith.constant 0 : i32
    return %arg0, %c0_i32, %c0_i32_0, %c0_i32_1 : i32, i32, i32, i32
  }
  func.func @transform_3(%arg0: i32, %arg1: i32) -> (i32, i32, i32) {
    %c0_i32 = arith.constant 0 : i32
    %c0_i32_0 = arith.constant 0 : i32
    %c0_i32_1 = arith.constant 0 : i32
    %c0_i32_2 = arith.constant 0 : i32
    return %c0_i32, %c0_i32_0, %c0_i32_1 : i32, i32, i32
  }
  func.func @transform_4(%arg0: i32, %arg1: i32) -> (i32, i32) {
    %c0_i32 = arith.constant 0 : i32
    %c0_i32_0 = arith.constant 0 : i32
    %c0_i32_1 = arith.constant 0 : i32
    return %c0_i32, %c0_i32_0 : i32, i32
  }
  func.func @transform_5(%arg0: i32, %arg1: i32) -> (i32, i32, i32) {
    %c0_i32 = arith.constant 0 : i32
    %c0_i32_0 = arith.constant 0 : i32
    return %arg0, %arg1, %c0_i32 : i32, i32, i32
  }
}

</mosaic_0001>

<bundles_post_ra>
// kernel: multi_head_self_attention.2
= control target key start
LH: loop header
LB: loop body
LE: loop exit
PB: predicated region body
PF: predicated region fallthrough
CT: control target
= control target key end

     0   :  { %11 = vsyncpa [#allocation3], 0  ;;  %s899_s0 = inlined_call_operand.hbm [shape: f32[16,32], index: 0, kind: input, shape index: {}]   ;;  %s900_s1 = inlined_call_operand.hbm [shape: f32[32,96], index: 1, kind: input, shape index: {}]   ;;  %s901_s2 = inlined_call_operand.vmem [shape: f32[1,96], index: 2, kind: input, shape index: {}]   ;;  %s902_s3 = inlined_call_operand.vmem [shape: f32[16,32], index: 3, kind: output, shape index: {0}]   ;;  %s903_s4 = inlined_call_operand.vmem [shape: f32[16,32], index: 4, kind: output, shape index: {1}]   ;;  %s904_s5 = inlined_call_operand.vmem [shape: f32[16,32], index: 5, kind: output, shape index: {2}]  }
   0x1   :  { %12 = vsyncpa [#allocation5], 0  ;;  %s780_s18 = smov [#allocation2]  }
   0x2   :  { %s18_s19 = sshll.u32 %s780_s18, 4  ;;  %s19_s19 = int_to_ptr.vmem [resolvable:$true] %s18_s19 }
   0x3   :  { %s744_s20 = scalar_lea.vmem %s19_s19, 256  ;;  %p749_p1 = scmp.lt.s32.totalorder %s19_s19, %s19_s19 }
   0x4   :  { %p745_p0 = scmp.ne.s32.totalorder %s19_s19, %s744_s20  ;;  %p750_p2 = scmp.lt.s32.totalorder %s744_s20, %s744_s20 }
   0x6   :  { %p751_p3 = por %p750_p2, %p749_p1 }
   0x8   :  { %p752_p4 = pnand %p751_p3, %p745_p0 }
   0xa   :  { %755 = shalt.err (!%p752_p4)
}
   0xb   :  { %s781_s21 = smov 128   ;;  %s782_s22 = smov 8  }
   0xc   :  { %24 = dma.hbm_to_vmem [thread:$0]  %s899_s0, 256, %s19_s19, [#allocation3], %s781_s21, %s781_s21, %s782_s22  }
   0xd   :  { %s783_s25 = smov [#allocation4]  }
   0xe   :  { %s30_s26 = sshll.u32 %s783_s25, 4  ;;  %s31_s26 = int_to_ptr.vmem [resolvable:$true] %s30_s26 }
   0xf   :  { %s764_s27 = scalar_lea.vmem %s31_s26, 512  ;;  %p769_p6 = scmp.lt.s32.totalorder %s31_s26, %s31_s26 }
  0x10   :  { %p765_p5 = scmp.ne.s32.totalorder %s31_s26, %s764_s27  ;;  %p770_p7 = scmp.lt.s32.totalorder %s764_s27, %s764_s27 }
  0x12   :  { %p771_p8 = por %p770_p7, %p769_p6 }
  0x14   :  { %p772_p9 = pnand %p771_p8, %p765_p5 }
  0x16   :  { %775 = shalt.err (!%p772_p9)
}
  0x17   :  { %36 = dma.hbm_to_vmem [thread:$0]  %s900_s1, 512, %s31_s26, [#allocation5], %s781_s21, %s781_s21, %s782_s22  }
  0x18   :  { %776 = dma.done.wait [#allocation3], 256  }
  0x19   :  { %777 = vsyncadd [#allocation3], 4294967040 }
  0x1a   :  { %778 = dma.done.wait [#allocation5], 512  }
  0x1b   :  { %779 = vsyncadd [#allocation5], 4294966784  ;;  %vm58_vm0 = vcmask 261120   ;;  %v50_v0 = vld [vmem:[#allocation4 + $0x18] sm:$0xff]  ;;  %v49_v1 = vld [vmem:[#allocation4 + $0x10] sm:$0xff]  ;;  %s784_s8 = smov 64  }
  0x1c   :  { %v48_v2 = vld [vmem:[#allocation4 + $0x8] sm:$0xff]  ;;  %v822_v3 = vand.u32 4294901760, %v50_v0  ;;  %v824_v4 = vand.u32 4294901760, %v49_v1  ;;  %v47_v6 = vld [vmem:[#allocation4] sm:$0xff]  ;;  %v45_v7 = vld [vmem:[#allocation2] sm:$0xff]  ;;  %s785_s9 = smov 96  }
  0x1d   :  { %v826_v5 = vand.u32 4294901760, %v48_v2  ;;  %v46_v8 = vld [vmem:[#allocation2 + $0x8] sm:$0xff]  ;;  %v828_v9 = vand.u32 4294901760, %v47_v6  ;;  %v60_v10 = vsel %vm58_vm0, %v45_v7, 0  ;;  %v627_v39 = vld [vmem:[%s901_s2] ss:$0 sm:$0xff] }
  0x1e   :  { %v63_v11 = vsel %vm58_vm0, %v46_v8, 0  ;;  %664 = vmatprep.subr.mxu0 %v822_v3  ;;  %v180_v12 = vsub.f32 %v50_v0, %v822_v3  ;;  %v834_v13 = vand.u32 4294901760, %v60_v10  ;;  %v187_v14 = vsub.f32 %v49_v1, %v824_v4 }
  0x1f   :  { %v837_v15 = vand.u32 4294901760, %v63_v11  ;;  %665 = vmatpush3.msra.mxu0 %v822_v3  ;;  %v194_v16 = vsub.f32 %v48_v2, %v826_v5  ;;  %v201_v17 = vsub.f32 %v47_v6, %v828_v9 }
  0x20   :  { %666 = vmatprep.subr.mxu0 %v824_v4  ;;  %v181_v18 = vand.u32 4294901760, %v180_v12  ;;  %v135_v19 = vsub.f32 %v60_v10, %v834_v13  ;;  %v188_v20 = vand.u32 4294901760, %v187_v14  ;;  %683 = vmatprep.mubr.f32.mxu1 %v834_v13 }
  0x21   :  { %v145_v21 = vsub.f32 %v63_v11, %v837_v15  ;;  %667 = vmatpush3.msra.mxu0 %v824_v4  ;;  %v195_v22 = vand.u32 4294901760, %v194_v16  ;;  %v202_v23 = vand.u32 4294901760, %v201_v17 }
  0x22   :  { %668 = vmatprep.subr.mxu0 %v826_v5  ;;  %v182_v24 = vsub.f32 %v180_v12, %v181_v18  ;;  %v136_v25 = vand.u32 4294901760, %v135_v19  ;;  %v189_v26 = vsub.f32 %v187_v14, %v188_v20 }
  0x23   :  { %v146_v27 = vand.u32 4294901760, %v145_v21  ;;  %669 = vmatpush3.msra.mxu0 %v826_v5  ;;  %v196_v28 = vsub.f32 %v194_v16, %v195_v22  ;;  %v203_v29 = vsub.f32 %v201_v17, %v202_v23 }
  0x24   :  { %670 = vmatprep.subr.mxu0 %v828_v9  ;;  %v183_v30 = vand.u32 4294901760, %v182_v24  ;;  %v137_v31 = vsub.f32 %v135_v19, %v136_v25  ;;  %v190_v32 = vand.u32 4294901760, %v189_v26 }
  0x25   :  { %v147_v33 = vsub.f32 %v145_v21, %v146_v27  ;;  %671 = vmatpush3.msra.mxu0 %v828_v9  ;;  %v197_v36 = vand.u32 4294901760, %v196_v28  ;;  %v204_v37 = vand.u32 4294901760, %v203_v29 }
  0x26   :  { %675 = vmatprep.subr.mxu1 %v183_v30  ;;  %v138_v34 = vand.u32 4294901760, %v137_v31  ;;  %686 = vmatprep.subr.mxu0 %v180_v12 }
  0x27   :  { %v148_v35 = vand.u32 4294901760, %v147_v33  ;;  %676 = vmatpush3.msra.mxu1 %v183_v30 }
  0x28   :  { %672 = vmatprep.mubr.f32.mxu0 %v138_v34  ;;  %677 = vmatprep.subr.mxu1 %v190_v32 }
  0x29   :  { %673 = vmatmul.mubr.f32.vlgmr.msra.gmra.mxu0 %v148_v35  ;;  %678 = vmatpush3.msra.mxu1 %v190_v32 }
  0x2a   :  { %687 = vmatpush3.msra.mxu0 %v180_v12  ;;  %679 = vmatprep.subr.mxu1 %v197_v36 }
  0x2b   :  { %688 = vmatprep.subr.mxu0 %v187_v14  ;;  %680 = vmatpush3.msra.mxu1 %v197_v36 }
  0x2c   :  { %689 = vmatpush3.msra.mxu0 %v187_v14  ;;  %681 = vmatprep.subr.mxu1 %v204_v37 }
  0x2d   :  { %690 = vmatprep.subr.mxu0 %v194_v16  ;;  %682 = vmatpush3.msra.mxu1 %v204_v37 }
  0x2e   :  { %691 = vmatpush3.msra.mxu0 %v194_v16  ;;  %684 = vmatmul.mubr.f32.vlgmr.msra.gmra.mxu1 %v837_v15 }
  0x2f   :  { %692 = vmatprep.subr.mxu0 %v201_v17  ;;  %697 = vmatprep.subr.mxu1 %v822_v3 }
  0x30   :  { %693 = vmatpush3.msra.mxu0 %v201_v17  ;;  %694 = vmatprep.mubr.f32.mxu0 %v135_v19 }
  0x31   :  { %698 = vmatpush3.msra.mxu1 %v822_v3  ;;  %695 = vmatmul.mubr.f32.vlgmr.msra.gmra.mxu0 %v145_v21 }
  0x32   :  { %699 = vmatprep.subr.mxu1 %v824_v4  ;;  %708 = vmatprep.subr.mxu0 %v181_v18 }
  0x33   :  { %700 = vmatpush3.msra.mxu1 %v824_v4  ;;  %709 = vmatpush3.msra.mxu0 %v181_v18 }
  0x34   :  { %701 = vmatprep.subr.mxu1 %v826_v5  ;;  %710 = vmatprep.subr.mxu0 %v188_v20 }
  0x35   :  { %702 = vmatpush3.msra.mxu1 %v826_v5  ;;  %711 = vmatpush3.msra.mxu0 %v188_v20 }
  0x36   :  { %703 = vmatprep.subr.mxu1 %v828_v9  ;;  %712 = vmatprep.subr.mxu0 %v195_v22 }
  0x37   :  { %704 = vmatpush3.msra.mxu1 %v828_v9  ;;  %705 = vmatprep.mubr.f32.mxu1 %v136_v25 }
  0x38   :  { %713 = vmatpush3.msra.mxu0 %v195_v22  ;;  %706 = vmatmul.mubr.f32.vlgmr.msra.gmra.mxu1 %v146_v27 }
  0x39   :  { %714 = vmatprep.subr.mxu0 %v202_v23  ;;  %719 = vmatprep.subr.mxu1 %v822_v3 }
  0x3a   :  { %715 = vmatpush3.msra.mxu0 %v202_v23  ;;  %716 = vmatprep.mubr.f32.mxu0 %v834_v13 }
  0x3b   :  { %720 = vmatpush3.msra.mxu1 %v822_v3  ;;  %717 = vmatmul.mubr.f32.vlgmr.msra.gmra.mxu0 %v837_v15 }
  0x3c   :  { %721 = vmatprep.subr.mxu1 %v824_v4  ;;  %727 = vmatprep.mubr.f32.mxu1 %v834_v13 }
  0x3d   :  { %722 = vmatpush3.msra.mxu1 %v824_v4 }
  0x3e   :  { %723 = vmatprep.subr.mxu1 %v826_v5 }
  0x3f   :  { %724 = vmatpush3.msra.mxu1 %v826_v5 }
  0x40   :  { %725 = vmatprep.subr.mxu1 %v828_v9 }
  0x41   :  { %726 = vmatpush3.msra.mxu1 %v828_v9 }
  0x42   :  { %728 = vmatmul.mubr.f32.vlgmr.msra.gmra.mxu1 %v837_v15 }
  0xe9   :  { %v674_v38 = vpop.f32.mrf.mxu0 }
  0xea   :  { %v151_v42 = vadd.f32 %v674_v38, %v627_v39 }
  0xeb   :  { %v140_v40 = vpop.f32.mrf.mxu0 }
  0xec   :  { %v141_v43 = vadd.f32 %v627_v39, %v140_v40 }
  0xee   :  { %v685_v41 = vpop.f32.mrf.mxu1 }
  0xef   :  { %v248_v46 = vadd.f32 %v685_v41, %v151_v42 }
  0xf0   :  { %v241_v44 = vpop.f32.mrf.mxu1 }
  0xf1   :  { %v696_v45 = vpop.f32.mrf.mxu0  ;;  %v242_v48 = vadd.f32 %v241_v44, %v141_v43 }
  0xf2   :  { %v335_v50 = vadd.f32 %v696_v45, %v248_v46 }
  0xf3   :  { %v327_v49 = vpop.f32.mrf.mxu0 }
  0xf4   :  { %v328_v53 = vadd.f32 %v327_v49, %v242_v48 }
  0xf8   :  { %v707_v47 = vpop.f32.mrf.mxu1 }
  0xf9   :  { %v420_v54 = vadd.f32 %v707_v47, %v335_v50 }
  0xfa   :  { %v411_v51 = vpop.f32.mrf.mxu1 }
  0xfb   :  { %v718_v52 = vpop.f32.mrf.mxu0  ;;  %v412_v55 = vadd.f32 %v411_v51, %v328_v53 }
  0xfc   :  { %v509_v57 = vadd.f32 %v718_v52, %v420_v54 }
  0xfd   :  { %v502_v56 = vpop.f32.mrf.mxu0 }
  0xfe   :  { %v503_v59 = vadd.f32 %v502_v56, %v412_v55 }
 0x102   :  { %v729_v58 = vpop.f32.mrf.mxu1 }
 0x103   :  { %v590_v60 = vadd.f32 %v729_v58, %v509_v57 }
 0x104   :  { %v583_v61 = vpop.f32.mrf.mxu1 }
 0x105   :  { %594 = vst.msk [vmem:[%s902_s3 + $0x8] sm:$0xff] %vm58_vm0, %v590_v60  ;;  %v584_v62 = vadd.f32 %v583_v61, %v503_v59 }
 0x107   :  { %593 = vst.msk [vmem:[%s902_s3] sm:$0xff] %vm58_vm0, %v584_v62  ;;  %605 = vrot.lane.b32.xlu1 %v584_v62, %s784_s8  ;;  %597 = vrot.lane.b32.xlu0 %v584_v62, %s785_s9 }
 0x10b   :  { %607 = vrot.lane.b32.xlu1 %v590_v60, %s784_s8  ;;  %599 = vrot.lane.b32.xlu0 %v590_v60, %s785_s9 }
 0x179   :  { %v606_v63 = vpop.permute.xlu1 %605  ;;  %v598_v0 = vpop.permute.xlu0 %597 }
 0x17a   :  { %611 = vst.msk [vmem:[%s904_s5] sm:$0xff] %vm58_vm0, %v606_v63  ;;  %603 = vst.msk [vmem:[%s903_s4] sm:$0xff] %vm58_vm0, %v598_v0 }
 0x17d   :  { %v608_v1 = vpop.permute.xlu1 %607  ;;  %v600_v2 = vpop.permute.xlu0 %599 }
 0x17e   :  { %612 = vst.msk [vmem:[%s904_s5 + $0x8] sm:$0xff] %vm58_vm0, %v608_v1  ;;  %604 = vst.msk [vmem:[%s903_s4 + $0x8] sm:$0xff] %vm58_vm0, %v600_v2 }
 0x17f   :  { %625 = vsyncpa [#allocation3], 1 }
 0x180   :  { %626 = vsyncpa [#allocation5], 1 }

// kernel: multi_head_self_attention.3
= control target key start
LH: loop header
LB: loop body
LE: loop exit
PB: predicated region body
PF: predicated region fallthrough
CT: control target
= control target key end

     0   :  { %10 = vsyncpa [#allocation3], 0  ;;  %s7152_s0 = inlined_call_operand.vmem [shape: f32[2,4,8,8], index: 0, kind: input, shape index: {}]   ;;  %s7153_s1 = inlined_call_operand.vmem [shape: f32[2,4,8,8], index: 1, kind: input, shape index: {}]   ;;  %s7154_s2 = inlined_call_operand.vmem [shape: f32[2,4,8,8], index: 2, kind: input, shape index: {}]   ;;  %s7155_s3 = inlined_call_operand.vmem [shape: f32[4,8,32], index: 3, kind: input, shape index: {}]   ;;  %s7156_s4 = inlined_call_operand.vmem [shape: f32[1,32], index: 4, kind: input, shape index: {}]   ;;  %s7157_s5 = inlined_call_operand.hbm [shape: f32[2,8,32], index: 5, kind: output, shape index: {}]  }
   0x1   :  { %12 = vsyncpa [#allocation3 + $0x1], 0  ;;  %s6582_s18 = smov 0   ;;  %s6584_s19 = smov 0  }
   0x2   :  { %s6586_s20 = smov 0   ;;  %s6588_s21 = smov 0  }
   0x3   :  { %s6590_s22 = smov 0   ;;  %s6592_s23 = smov 0  }
   0x4 LB: > { %s5874_s24 = sadd.s32 4294967295, %s6547_s23   ;;  %s5875_s25 = sadd.s32 4294967294, %s6547_s23   ;;  %s6547_s23 = sphi %s6592_s23, %s18_s23   ;;  %s6543_s22 = sphi %s6590_s22, %s7164_s22   ;;  %s6539_s21 = sphi %s6588_s21, %s7163_s21   ;;  %s6535_s20 = sphi %s6586_s20, %s7162_s20   ;;  %s6531_s19 = sphi %s6584_s19, %s7161_s19   ;;  %s6527_s18 = sphi %s6582_s18, %s7160_s18  }
   0x5   : > { %s30_s26 = sadd.s32 1, %s6543_s22  ;;  %s161_s27 = sadd.s32 1, %s6535_s20 }
   0x6   : > { %p32_p0 = scmp.ge.s32.totalorder %s30_s26, 2  ;;  %p171_p1 = scmp.ne.s32.totalorder %s6535_s20, %s6531_s19 }
   0x7   : > { %p172_p2 = scmp.eq.s32.totalorder %s5874_s24, 1  ;;  %p177_p3 = scmp.ne.s32.totalorder %s6531_s19, %s6527_s18 }
   0x8   : > { %s7166_s26 = smov (%p32_p0, %s30_s26), 0  ;;  %p178_p5 = scmp.eq.s32.totalorder %s5875_s25, 1 }
   0x9   : > { %p6622_p4 = por %p172_p2, %p171_p1  ;;  %s156_s29 = ssub.s32 %s6543_s22, %s7166_s26 }
   0xa   : > { %p5878_p6 = scmp.ge.s32.totalorder %s6547_s23, 1  ;;  %p159_p7 = scmp.eq.s32.totalorder %s156_s29, 0 }
   0xb   : > { %p6629_p8 = por %p178_p5, %p177_p3  ;;  %p229_p9 = scmp.lt.s32.totalorder %s6547_s23, 3 }
   0xc   : > { %s6635_s6 = scalar_select %p159_p7, %s6535_s20, %s161_s27  }
   0xd   : > { %p230_p10 = pnand %p5878_p6, %p229_p9 }
   0xe   : > { %p270_p11 = scmp.lt.s32.totalorder (!%p230_p10), %s6539_s21, 1  ;;  %s5888_s15 = sshll.u32 (!%p230_p10), %s6539_s21, 7 }
   0xf   : > { %233 = sbr.rel (%p230_p10) target bundleno = 898 (0x382), region = 40  ;;  %s5774_s27 = scalar_lea.hbm (!%p230_p10), %s7157_s5, %s5888_s15 }
  0x14   : > { %v6549_v0 = vmov 0.0   ;;  %vm6550_vm0 = vmmov 0   ;;  %s271_s7 = scalar_select %p270_p11, %s6539_s21, 1  ;;  %vm300_vm1 = vcmask 64512   ;;  %vm5759_vm2 = vcmask 261120  }
  0x15   : > { %6038 = vmatprep.subr.mxu0 %v6549_v0  ;;  %6040 = vmatprep.mubr.msk.f32.mxu0 %vm6550_vm0, %v6549_v0 }
  0x16   : > { %6043 = vmatprep.subr.mxu1 %v6549_v0  ;;  %6045 = vmatprep.mubr.msk.f32.mxu1 %vm6550_vm0, %v6549_v0  ;;  %s6645_s8 = sshll.u32 %s271_s7, 5 }
  0x17   : > { %s6651_s11 = scalar_lea.vmem %s7153_s1, %s6645_s8  ;;  %s6657_s14 = scalar_lea.vmem %s7152_s0, %s6645_s8 }
  0x18   : > { %v292_v1 = vld [vmem:[%s6651_s11] sm:$0xff]  ;;  %v293_v3 = vld [vmem:[%s6651_s11 + $0x8] sm:$0xff]  ;;  %v294_v23 = vld [vmem:[%s6651_s11 + $0x10] sm:$0xff]  ;;  %s6802_s17 = scalar_lea.vmem %s7154_s2, %s6645_s8  ;;  %s6551_s8 = smov [#allocation2]  }
  0x19   : > { %v288_v2 = vld [vmem:[%s6657_s14] sm:$0xff]  ;;  %v305_v4 = vsel %vm300_vm1, %v292_v1, 0  ;;  %v757_v6 = vsel %vm300_vm1, %v293_v3, 0  ;;  %v289_v7 = vld [vmem:[%s6657_s14 + $0x8] sm:$0xff]  ;;  %v290_v24 = vld [vmem:[%s6657_s14 + $0x10] sm:$0xff]  ;;  %v1209_v27 = vsel %vm300_vm1, %v294_v23, 0 }
  0x1a   : > { %v302_v5 = vsel %vm300_vm1, %v288_v2, 0  ;;  %v338_v8 = vand.u32 4294901760, %v305_v4  ;;  %v754_v10 = vsel %vm300_vm1, %v289_v7, 0  ;;  %v6667_v13 = vand.u32 4294901760, %v757_v6  ;;  %v295_v37 = vld [vmem:[%s6651_s11 + $0x18] sm:$0xff]  ;;  %s267_s11 = sand.u32 1, %s6531_s19  }
  0x1b   : > { %v373_v9 = vand.u32 4294901760, %v302_v5  ;;  %v6669_v14 = vand.u32 4294901760, %v754_v10  ;;  %v1206_v28 = vsel %vm300_vm1, %v290_v24, 0  ;;  %v6686_v31 = vand.u32 4294901760, %v1209_v27  ;;  %v291_v38 = vld [vmem:[%s6657_s14 + $0x18] sm:$0xff]  ;;  %s5879_s12 = sshll.u32 %s267_s11, 3 }
  0x1c   : > { %6039 = vmatpush3.xpose.msra.mxu0 %v338_v8  ;;  %v415_v12 = vsub.f32 %v305_v4, %v338_v8  ;;  %v867_v19 = vsub.f32 %v757_v6, %v6667_v13  ;;  %v6688_v32 = vand.u32 4294901760, %v1206_v28  ;;  %v1661_v41 = vsel %vm300_vm1, %v295_v37, 0  ;;  %s269_s16 = scalar_lea.vmem [#allocation2], %s5879_s12  ;;  %s5762_s29 = scalar_lea.sflag [#allocation3], %s267_s11 }
  0x1d   : > { %v374_v11 = vsub.f32 %v302_v5, %v373_v9  ;;  %6048 = vmatprep.subr.mxu0 %v6549_v0  ;;  %v6674_v20 = vsub.f32 %v754_v10, %v6669_v14  ;;  %v1319_v35 = vsub.f32 %v1209_v27, %v6686_v31  ;;  %v1658_v42 = vsel %vm300_vm1, %v291_v38, 0  ;;  %s6475_s9 = sshll.u32 %s6551_s8, 4  ;;  %s6476_s9 = int_to_ptr.vmem [resolvable:$false] %s6475_s9 }
  0x1e   : > { %v416_v16 = vand.u32 4294901760, %v415_v12  ;;  %v868_v26 = vand.u32 4294901760, %v867_v19  ;;  %v6698_v36 = vsub.f32 %v1206_v28, %v6688_v32  ;;  %v6722_v45 = vand.u32 4294901760, %v1661_v41  ;;  %s6477_s21 = scalar_lea.vmem %s6476_s9, 256 }
  0x1f   : > { %v375_v15 = vand.u32 4294901760, %v374_v11  ;;  %v827_v25 = vand.u32 4294901760, %v6674_v20  ;;  %v1320_v39 = vand.u32 4294901760, %v1319_v35  ;;  %v6724_v46 = vand.u32 4294901760, %v1658_v42 }
  0x20   : > { %v417_v18 = vsub.f32 %v415_v12, %v416_v16  ;;  %v869_v30 = vsub.f32 %v867_v19, %v868_v26  ;;  %v1279_v40 = vand.u32 4294901760, %v6698_v36  ;;  %v1771_v49 = vsub.f32 %v1661_v41, %v6722_v45 }
  0x21   : > { %v376_v17 = vsub.f32 %v374_v11, %v375_v15  ;;  %v828_v29 = vsub.f32 %v6674_v20, %v827_v25  ;;  %v1321_v43 = vsub.f32 %v1319_v35, %v1320_v39  ;;  %v1730_v50 = vsub.f32 %v1658_v42, %v6724_v46 }
  0x22   : > { %v418_v22 = vand.u32 4294901760, %v417_v18  ;;  %v870_v34 = vand.u32 4294901760, %v869_v30  ;;  %v1280_v44 = vsub.f32 %v6698_v36, %v1279_v40  ;;  %v1772_v51 = vand.u32 4294901760, %v1771_v49 }
  0x23   : > { %v377_v21 = vand.u32 4294901760, %v376_v17  ;;  %v829_v33 = vand.u32 4294901760, %v828_v29  ;;  %v1322_v47 = vand.u32 4294901760, %v1321_v43  ;;  %v1731_v52 = vand.u32 4294901760, %v1730_v50 }
  0x24   : > { %6044 = vmatpush3.xpose.msra.mxu1 %v418_v22  ;;  %v1281_v48 = vand.u32 4294901760, %v1280_v44  ;;  %v1773_v53 = vsub.f32 %v1771_v49, %v1772_v51  ;;  %v296_v44 = vld [vmem:[%s6802_s17] sm:$0xff] }
  0x25   : > { %6041 = vmatmul.mubr.f32.vlgmr.msra.gmra.mxu0 %v377_v21  ;;  %6053 = vmatprep.subr.mxu1 %v6549_v0  ;;  %v1732_v54 = vsub.f32 %v1730_v50, %v1731_v52 }
  0x26   : > { %6049 = vmatpush3.xpose.msra.mxu0 %v415_v12  ;;  %6050 = vmatprep.mubr.msk.f32.mxu0 %vm6550_vm0, %v6549_v0  ;;  %v1774_v55 = vand.u32 4294901760, %v1773_v53 }
  0x27   : > { %6058 = vmatprep.subr.mxu0 %v6549_v0  ;;  %6046 = vmatmul.mubr.f32.vlgmr.msra.gmra.mxu1 %v373_v9  ;;  %v1733_v56 = vand.u32 4294901760, %v1732_v54 }
  0x28   : > { %6054 = vmatpush3.xpose.msra.mxu1 %v338_v8  ;;  %6055 = vmatprep.mubr.msk.f32.mxu1 %vm6550_vm0, %v6549_v0 }
  0x29   : > { %6051 = vmatmul.mubr.f32.vlgmr.msra.gmra.mxu0 %v374_v11  ;;  %6063 = vmatprep.subr.mxu1 %v6549_v0 }
  0x2a   : > { %6059 = vmatpush3.xpose.msra.mxu0 %v416_v16  ;;  %6060 = vmatprep.mubr.msk.f32.mxu0 %vm6550_vm0, %v6549_v0 }
  0x2b   : > { %6056 = vmatmul.mubr.f32.vlgmr.msra.gmra.mxu1 %v375_v15  ;;  %6068 = vmatprep.subr.mxu0 %v6549_v0 }
  0x2c   : > { %6064 = vmatpush3.xpose.msra.mxu1 %v338_v8  ;;  %6065 = vmatprep.mubr.msk.f32.mxu1 %vm6550_vm0, %v6549_v0 }
  0x2d   : > { %6061 = vmatmul.mubr.f32.vlgmr.msra.gmra.mxu0 %v373_v9  ;;  %6073 = vmatprep.subr.mxu1 %v6549_v0 }
  0x2e   : > { %6069 = vmatpush3.xpose.msra.mxu0 %v6667_v13  ;;  %6070 = vmatprep.mubr.msk.f32.mxu0 %vm6550_vm0, %v6549_v0 }
  0x2f   : > { %6066 = vmatmul.mubr.f32.vlgmr.msra.gmra.mxu1 %v373_v9  ;;  %6078 = vmatprep.subr.mxu0 %v6549_v0 }
  0x30   : > { %6074 = vmatpush3.xpose.msra.mxu1 %v870_v34  ;;  %6075 = vmatprep.mubr.msk.f32.mxu1 %vm6550_vm0, %v6549_v0 }
  0x31   : > { %6071 = vmatmul.mubr.f32.vlgmr.msra.gmra.mxu0 %v829_v33  ;;  %6083 = vmatprep.subr.mxu1 %v6549_v0 }
  0x32   : > { %6079 = vmatpush3.xpose.msra.mxu0 %v867_v19  ;;  %6080 = vmatprep.mubr.msk.f32.mxu0 %vm6550_vm0, %v6549_v0 }
  0x33   : > { %6076 = vmatmul.mubr.f32.vlgmr.msra.gmra.mxu1 %v6669_v14  ;;  %6088 = vmatprep.subr.mxu0 %v6549_v0 }
  0x34   : > { %6084 = vmatpush3.xpose.msra.mxu1 %v6667_v13  ;;  %6085 = vmatprep.mubr.msk.f32.mxu1 %vm6550_vm0, %v6549_v0 }
  0x35   : > { %6081 = vmatmul.mubr.f32.vlgmr.msra.gmra.mxu0 %v6674_v20  ;;  %6093 = vmatprep.subr.mxu1 %v6549_v0 }
  0x36   : > { %6089 = vmatpush3.xpose.msra.mxu0 %v868_v26  ;;  %6090 = vmatprep.mubr.msk.f32.mxu0 %vm6550_vm0, %v6549_v0 }
  0x37   : > { %6086 = vmatmul.mubr.f32.vlgmr.msra.gmra.mxu1 %v827_v25  ;;  %6098 = vmatprep.subr.mxu0 %v6549_v0 }
  0x38   : > { %6094 = vmatpush3.xpose.msra.mxu1 %v6667_v13  ;;  %6095 = vmatprep.mubr.msk.f32.mxu1 %vm6550_vm0, %v6549_v0 }
  0x39   : > { %6091 = vmatmul.mubr.f32.vlgmr.msra.gmra.mxu0 %v6669_v14  ;;  %6103 = vmatprep.subr.mxu1 %v6549_v0 }
  0x3a   : > { %6099 = vmatpush3.xpose.msra.mxu0 %v6686_v31  ;;  %6100 = vmatprep.mubr.msk.f32.mxu0 %vm6550_vm0, %v6549_v0 }
  0x3b   : > { %6096 = vmatmul.mubr.f32.vlgmr.msra.gmra.mxu1 %v6669_v14  ;;  %6108 = vmatprep.subr.mxu0 %v6549_v0 }
  0x3c   : > { %6104 = vmatpush3.xpose.msra.mxu1 %v1322_v47  ;;  %6105 = vmatprep.mubr.msk.f32.mxu1 %vm6550_vm0, %v6549_v0 }
  0x3d   : > { %6101 = vmatmul.mubr.f32.vlgmr.msra.gmra.mxu0 %v1281_v48  ;;  %6113 = vmatprep.subr.mxu1 %v6549_v0 }
  0x3e   : > { %6109 = vmatpush3.xpose.msra.mxu0 %v1319_v35  ;;  %6110 = vmatprep.mubr.msk.f32.mxu0 %vm6550_vm0, %v6549_v0 }
  0x3f   : > { %6106 = vmatmul.mubr.f32.vlgmr.msra.gmra.mxu1 %v6688_v32  ;;  %6118 = vmatprep.subr.mxu0 %v6549_v0 }
  0x40   : > { %6114 = vmatpush3.xpose.msra.mxu1 %v6686_v31  ;;  %6115 = vmatprep.mubr.msk.f32.mxu1 %vm6550_vm0, %v6549_v0 }
  0x41   : > { %6111 = vmatmul.mubr.f32.vlgmr.msra.gmra.mxu0 %v6698_v36  ;;  %6123 = vmatprep.subr.mxu1 %v6549_v0 }
  0x42   : > { %6119 = vmatpush3.xpose.msra.mxu0 %v1320_v39  ;;  %6120 = vmatprep.mubr.msk.f32.mxu0 %vm6550_vm0, %v6549_v0 }
  0x43   : > { %6116 = vmatmul.mubr.f32.vlgmr.msra.gmra.mxu1 %v1279_v40  ;;  %6128 = vmatprep.subr.mxu0 %v6549_v0 }
  0x44   : > { %6124 = vmatpush3.xpose.msra.mxu1 %v6686_v31  ;;  %6125 = vmatprep.mubr.msk.f32.mxu1 %vm6550_vm0, %v6549_v0 }
  0x45   : > { %6121 = vmatmul.mubr.f32.vlgmr.msra.gmra.mxu0 %v6688_v32  ;;  %6133 = vmatprep.subr.mxu1 %v6549_v0 }
  0x46   : > { %6129 = vmatpush3.xpose.msra.mxu0 %v6722_v45  ;;  %6130 = vmatprep.mubr.msk.f32.mxu0 %vm6550_vm0, %v6549_v0 }
  0x47   : > { %6126 = vmatmul.mubr.f32.vlgmr.msra.gmra.mxu1 %v6688_v32  ;;  %6138 = vmatprep.subr.mxu0 %v6549_v0 }
  0x48   : > { %6134 = vmatpush3.xpose.msra.mxu1 %v1774_v55  ;;  %6135 = vmatprep.mubr.msk.f32.mxu1 %vm6550_vm0, %v6549_v0 }
  0x49   : > { %6131 = vmatmul.mubr.f32.vlgmr.msra.gmra.mxu0 %v1733_v56  ;;  %6143 = vmatprep.subr.mxu1 %v6549_v0 }
  0x4a   : > { %6139 = vmatpush3.xpose.msra.mxu0 %v1771_v49  ;;  %6140 = vmatprep.mubr.msk.f32.mxu0 %vm6550_vm0, %v6549_v0 }
  0x4b   : > { %6136 = vmatmul.mubr.f32.vlgmr.msra.gmra.mxu1 %v6724_v46  ;;  %6148 = vmatprep.subr.mxu0 %v6549_v0 }
  0x4c   : > { %6144 = vmatpush3.xpose.msra.mxu1 %v6722_v45  ;;  %6145 = vmatprep.mubr.msk.f32.mxu1 %vm6550_vm0, %v6549_v0 }
  0x4d   : > { %6141 = vmatmul.mubr.f32.vlgmr.msra.gmra.mxu0 %v1730_v50  ;;  %6153 = vmatprep.subr.mxu1 %v6549_v0 }
  0x4e   : > { %6149 = vmatpush3.xpose.msra.mxu0 %v1772_v51  ;;  %6150 = vmatprep.mubr.msk.f32.mxu0 %vm6550_vm0, %v6549_v0 }
  0x4f   : > { %6146 = vmatmul.mubr.f32.vlgmr.msra.gmra.mxu1 %v1731_v52  ;;  %6158 = vmatprep.subr.mxu0 %v6549_v0 }
  0x50   : > { %6154 = vmatpush3.xpose.msra.mxu1 %v6722_v45  ;;  %6155 = vmatprep.mubr.msk.f32.mxu1 %vm6550_vm0, %v6549_v0 }
  0x51   : > { %6151 = vmatmul.mubr.f32.vlgmr.msra.gmra.mxu0 %v6724_v46  ;;  %6163 = vmatprep.subr.mxu1 %v6549_v0 }
  0x52   : > { %6160 = vmatprep.mubr.msk.f32.mxu0 %vm6550_vm0, %v6549_v0 }
  0x53   : > { %6156 = vmatmul.mubr.f32.vlgmr.msra.gmra.mxu1 %v6724_v46  ;;  %v2179_v46 = vand.u32 4294901760, %v296_v44 }
  0x54   : > { %6165 = vmatprep.mubr.msk.f32.mxu1 %vm6550_vm0, %v6549_v0 }
  0x55   : > { %v6805_v50 = vsub.f32 %v296_v44, %v2179_v46  ;;  %6159 = vmatpush3.msra.mxu0 %v2179_v46 }
  0x56   : > { %6168 = vmatprep.subr.mxu0 %v6549_v0 }
  0x57   : > { %v2257_v54 = vand.u32 4294901760, %v6805_v50 }
  0xe5   : > { %v379_v57 = vpop.f32.mrf.mxu0 }
  0xe7   : > { %v6042_v58 = vpop.f32.mrf.mxu0  ;;  %v455_v59 = vpop.f32.mrf.mxu1 }
  0xe8   : > { %v456_v60 = vadd.f32 %v455_v59, %v379_v57  ;;  %v2258_v58 = vsub.f32 %v6805_v50, %v2257_v54 }
  0xe9   : > { %v529_v61 = vpop.f32.mrf.mxu0  ;;  %v6047_v62 = vpop.f32.mrf.mxu1 }
  0xea   : > { %v530_v63 = vadd.f32 %v529_v61, %v456_v60  ;;  %v2259_v62 = vand.u32 4294901760, %v2258_v58 }
  0xeb   : > { %v6052_v1 = vpop.f32.mrf.mxu0  ;;  %v603_v2 = vpop.f32.mrf.mxu1 }
  0xec   : > { %v604_v3 = vadd.f32 %v603_v2, %v530_v63  ;;  %6164 = vmatpush3.msra.mxu1 %v2259_v62 }
  0xed   : > { %v677_v4 = vpop.f32.mrf.mxu0  ;;  %v6057_v5 = vpop.f32.mrf.mxu1  ;;  %6173 = vmatprep.subr.mxu1 %v6549_v0 }
  0xee   : > { %v678_v6 = vadd.f32 %v677_v4, %v604_v3 }
  0xef   : > { %v6062_v7 = vpop.f32.mrf.mxu0  ;;  %v749_v8 = vpop.f32.mrf.mxu1 }
  0xf0   : > { %v6793_v9 = vadd.f32 %v749_v8, %v678_v6 }
  0xf1   : > { %v831_v10 = vpop.f32.mrf.mxu0  ;;  %v6067_v11 = vpop.f32.mrf.mxu1 }
  0xf2   : > { %v2109_v13 = vsel %vm300_vm1, %v6793_v9, -inf }
  0xf3   : > { %v6072_v12 = vpop.f32.mrf.mxu0  ;;  %v907_v14 = vpop.f32.mrf.mxu1  ;;  %2110 = vmax.xlane.f32.xlu0 %v2109_v13  ;;  %v297_v13 = vld [vmem:[%s6802_s17 + $0x8] sm:$0xff] }
  0xf4   : > { %v908_v15 = vadd.f32 %v907_v14, %v831_v10 }
  0xf5   : > { %v981_v16 = vpop.f32.mrf.mxu0  ;;  %v6077_v17 = vpop.f32.mrf.mxu1 }
  0xf6   : > { %v982_v18 = vadd.f32 %v981_v16, %v908_v15  ;;  %v6820_v15 = vand.u32 4294901760, %v297_v13 }
  0xf7   : > { %v6082_v19 = vpop.f32.mrf.mxu0  ;;  %v1055_v20 = vpop.f32.mrf.mxu1 }
  0xf8   : > { %v1056_v21 = vadd.f32 %v1055_v20, %v982_v18  ;;  %v6823_v18 = vsub.f32 %v297_v13, %v6820_v15 }
  0xf9   : > { %v1129_v22 = vpop.f32.mrf.mxu0  ;;  %v6087_v23 = vpop.f32.mrf.mxu1 }
  0xfa   : > { %v1130_v24 = vadd.f32 %v1129_v22, %v1056_v21  ;;  %v2706_v22 = vand.u32 4294901760, %v6823_v18 }
  0xfb   : > { %v6092_v25 = vpop.f32.mrf.mxu0  ;;  %v1201_v26 = vpop.f32.mrf.mxu1 }
  0xfc   : > { %v1202_v27 = vadd.f32 %v1201_v26, %v1130_v24  ;;  %v298_v24 = vld [vmem:[%s6802_s17 + $0x10] sm:$0xff] }
  0xfd   : > { %v1283_v28 = vpop.f32.mrf.mxu0  ;;  %v6097_v29 = vpop.f32.mrf.mxu1 }
  0xfe   : > { %v2112_v30 = vsel %vm300_vm1, %v1202_v27, -inf  ;;  %v6835_v29 = vand.u32 4294901760, %v298_v24 }
  0xff   : > { %v6102_v31 = vpop.f32.mrf.mxu0  ;;  %v1359_v32 = vpop.f32.mrf.mxu1  ;;  %2113 = vmax.xlane.f32.xlu0 %v2112_v30 }
 0x100   : > { %v1360_v33 = vadd.f32 %v1359_v32, %v1283_v28 }
 0x101   : > { %v1433_v34 = vpop.f32.mrf.mxu0  ;;  %v6107_v35 = vpop.f32.mrf.mxu1 }
 0x102   : > { %v1434_v36 = vadd.f32 %v1433_v34, %v1360_v33  ;;  %v6841_v34 = vsub.f32 %v298_v24, %v6835_v29 }
 0x103   : > { %v6112_v37 = vpop.f32.mrf.mxu0  ;;  %v1507_v38 = vpop.f32.mrf.mxu1 }
 0x104   : > { %v1508_v39 = vadd.f32 %v1507_v38, %v1434_v36 }
 0x105   : > { %v1581_v40 = vpop.f32.mrf.mxu0  ;;  %v6117_v41 = vpop.f32.mrf.mxu1 }
 0x106   : > { %v1582_v42 = vadd.f32 %v1581_v40, %v1508_v39  ;;  %v3155_v39 = vand.u32 4294901760, %v6841_v34  ;;  %v299_v41 = vld [vmem:[%s6802_s17 + $0x18] sm:$0xff]  ;;  %s5776_s17 = sshll.u32 %s269_s16, 4  ;;  %s5777_s17 = int_to_ptr.vmem [resolvable:$true] %s5776_s17 }
 0x107   : > { %v6122_v43 = vpop.f32.mrf.mxu0  ;;  %v1653_v45 = vpop.f32.mrf.mxu1  ;;  %s6471_s7 = scalar_lea.vmem %s5777_s17, 128  ;;  %p6478_p1 = scmp.lt.s32.totalorder %s5777_s17, %s6476_s9 }
 0x108   : > { %v1654_v47 = vadd.f32 %v1653_v45, %v1582_v42  ;;  %v3156_v45 = vsub.f32 %v6841_v34, %v3155_v39  ;;  %p6472_p12 = scmp.ne.s32.totalorder %s5777_s17, %s6471_s7  ;;  %p6479_p2 = scmp.lt.s32.totalorder %s6477_s21, %s6471_s7 }
 0x109   : > { %v1735_v48 = vpop.f32.mrf.mxu0  ;;  %v6127_v49 = vpop.f32.mrf.mxu1 }
 0x10a   : > { %v2115_v51 = vsel %vm300_vm1, %v1654_v47, -inf  ;;  %p6473_p13 = pnand %p6472_p12, %p6622_p4  ;;  %p6480_p3 = por %p6479_p2, %p6478_p1 }
 0x10b   : > { %v6132_v52 = vpop.f32.mrf.mxu0  ;;  %v1811_v53 = vpop.f32.mrf.mxu1  ;;  %2116 = vmax.xlane.f32.xlu1 %v2115_v51 }
 0x10c   : > { %v1812_v55 = vadd.f32 %v1811_v53, %v1735_v48  ;;  %p6474_p0 = pneg %p6473_p13 }
 0x10d   : > { %v1885_v56 = vpop.f32.mrf.mxu0  ;;  %v6137_v57 = vpop.f32.mrf.mxu1 }
 0x10e   : > { %v1886_v59 = vadd.f32 %v1885_v56, %v1812_v55  ;;  %p6481_p5 = pnand %p6480_p3, %p6474_p0 }
 0x10f   : > { %v6142_v60 = vpop.f32.mrf.mxu0  ;;  %v1959_v61 = vpop.f32.mrf.mxu1 }
 0x110   : > { %v1960_v63 = vadd.f32 %v1959_v61, %v1886_v59 }
 0x111   : > { %v2033_v1 = vpop.f32.mrf.mxu0  ;;  %v6147_v2 = vpop.f32.mrf.mxu1 }
 0x112   : > { %v2034_v3 = vadd.f32 %v2033_v1, %v1960_v63 }
 0x113   : > { %v6152_v4 = vpop.f32.mrf.mxu0  ;;  %v2105_v5 = vpop.f32.mrf.mxu1 }
 0x114   : > { %v6814_v6 = vadd.f32 %v2105_v5, %v2034_v3 }
 0x115   : > { %v6157_v7 = vpop.f32.mrf.mxu1 }
 0x116   : > { %v2118_v8 = vsel %vm300_vm1, %v6814_v6, -inf }
 0x117   : > { %2119 = vmax.xlane.f32.xlu1 %v2118_v8  ;;  %v3950_v8 = vld [vmem:[%s7155_s3 + $0x8] sm:$0xff] }
 0x17c   : > { %v2111_v10 = vpop.xlane.xlu0 %2110 }
 0x17d   : > { %v2121_v11 = vsub.f32 %v6793_v9, %v2111_v10  ;;  %v6952_v10 = vand.u32 4294901760, %v3950_v8 }
 0x17f   : > { %v2125_v12 = vmul.f32 1.442695, %v2121_v11  ;;  %v6955_v11 = vsub.f32 %v3950_v8, %v6952_v10 }
 0x181   : > { %6455 = vpow2.f32 %v2125_v12  ;;  %v4065_v12 = vand.u32 4294901760, %v6955_v11 }
 0x183   : > { %v4066_v13 = vsub.f32 %v6955_v11, %v4065_v12 }
 0x188   : > { %v2114_v14 = vpop.xlane.xlu0 %2113 }
 0x189   : > { %v2122_v16 = vsub.f32 %v1202_v27, %v2114_v14  ;;  %v2707_v27 = vsub.f32 %v6823_v18, %v2706_v22  ;;  %v4067_v14 = vand.u32 4294901760, %v4066_v13 }
 0x18b   : > { %v2127_v17 = vmul.f32 1.442695, %v2122_v16  ;;  %v2708_v33 = vand.u32 4294901760, %v2707_v27 }
 0x18d   : > { %6457 = vpow2.f32 %v2127_v17 }
 0x18e   : > { %v6456_v19 = vpop.eup %6455 }
 0x18f   : > { %v2133_v20 = vsel %vm300_vm1, %v6456_v19, 0.0  ;;  %v2146_v21 = vsel %vm300_vm1, %v6456_v19, 0 }
 0x190   : > { %2134 = vadd.xlane.f32.xlu1 %v2133_v20  ;;  %v2214_v9 = vand.u32 4294901760, %v2146_v21 }
 0x192   : > { %v2215_v23 = vsub.f32 %v2146_v21, %v2214_v9  ;;  %6166 = vmatmul.mubr.f32.vlgmr.msra.gmra.mxu1 %v2214_v9 }
 0x193   : > { %6174 = vmatpush3.msra.mxu1 %v2179_v46  ;;  %6175 = vmatprep.mubr.msk.f32.mxu1 %vm6550_vm0, %v6549_v0 }
 0x194   : > { %v2117_v25 = vpop.xlane.xlu1 %2116  ;;  %v2216_v26 = vand.u32 4294901760, %v2215_v23  ;;  %6183 = vmatprep.subr.mxu1 %v6549_v0 }
 0x195   : > { %v2123_v28 = vsub.f32 %v1654_v47, %v2117_v25 }
 0x196   : > { %6176 = vmatmul.mubr.f32.vlgmr.msra.gmra.mxu1 %v2216_v26  ;;  %v2217_v30 = vsub.f32 %v2215_v23, %v2216_v26 }
 0x197   : > { %v2129_v31 = vmul.f32 1.442695, %v2123_v28  ;;  %6184 = vmatpush3.msra.mxu1 %v2179_v46  ;;  %6185 = vmatprep.mubr.msk.f32.mxu1 %vm6550_vm0, %v6549_v0  ;;  %v6866_v46 = vand.u32 4294901760, %v299_v41 }
 0x198   : > { %v2218_v32 = vand.u32 4294901760, %v2217_v30  ;;  %6193 = vmatprep.subr.mxu1 %v6549_v0 }
 0x199   : > { %6459 = vpow2.f32 %v2129_v31  ;;  %v6877_v51 = vsub.f32 %v299_v41, %v6866_v46 }
 0x19a   : > { %v6458_v35 = vpop.eup %6457  ;;  %6161 = vmatmul.mubr.f32.vlgmr.msra.gmra.mxu0 %v2218_v32  ;;  %6186 = vmatmul.mubr.f32.vlgmr.msra.gmra.mxu1 %v2214_v9 }
 0x19b   : > { %6169 = vmatpush3.msra.mxu0 %v6805_v50  ;;  %v2136_v36 = vsel %vm300_vm1, %v6458_v35, 0.0  ;;  %6170 = vmatprep.mubr.msk.f32.mxu0 %vm6550_vm0, %v6549_v0  ;;  %v2595_v37 = vsel %vm300_vm1, %v6458_v35, 0  ;;  %v3157_v50 = vand.u32 4294901760, %v3156_v45  ;;  %v3604_v56 = vand.u32 4294901760, %v6877_v51 }
 0x19c   : > { %2137 = vadd.xlane.f32.xlu0 %v2136_v36  ;;  %6194 = vmatpush3.msra.mxu1 %v2708_v33  ;;  %v2663_v38 = vand.u32 4294901760, %v2595_v37 }
 0x19d   : > { %6195 = vmatprep.mubr.msk.f32.mxu1 %vm6550_vm0, %v6549_v0  ;;  %6178 = vmatprep.subr.mxu0 %v6549_v0  ;;  %v3605_v59 = vsub.f32 %v6877_v51, %v3604_v56 }
 0x19e   : > { %6171 = vmatmul.mubr.f32.vlgmr.msra.gmra.mxu0 %v2215_v23  ;;  %v2664_v40 = vsub.f32 %v2595_v37, %v2663_v38  ;;  %6196 = vmatmul.mubr.f32.vlgmr.msra.gmra.mxu1 %v2663_v38 }
 0x19f   : > { %6179 = vmatpush3.msra.mxu0 %v2257_v54  ;;  %6203 = vmatprep.subr.mxu1 %v6549_v0  ;;  %v3606_v62 = vand.u32 4294901760, %v3605_v59 }
 0x1a0   : > { %v2120_v42 = vpop.xlane.xlu1 %2119  ;;  %6180 = vmatprep.mubr.msk.f32.mxu0 %vm6550_vm0, %v6549_v0  ;;  %6204 = vmatpush3.msra.mxu1 %v6820_v15  ;;  %v2665_v43 = vand.u32 4294901760, %v2664_v40 }
 0x1a1   : > { %v2124_v44 = vsub.f32 %v6814_v6, %v2120_v42  ;;  %6205 = vmatprep.mubr.msk.f32.mxu1 %vm6550_vm0, %v6549_v0  ;;  %6188 = vmatprep.subr.mxu0 %v6549_v0 }
 0x1a2   : > { %6181 = vmatmul.mubr.f32.vlgmr.msra.gmra.mxu0 %v2214_v9  ;;  %6206 = vmatmul.mubr.f32.vlgmr.msra.gmra.mxu1 %v2665_v43  ;;  %v2666_v47 = vsub.f32 %v2664_v40, %v2665_v43 }
 0x1a3   : > { %v2131_v48 = vmul.f32 1.442695, %v2124_v44  ;;  %6189 = vmatpush3.msra.mxu0 %v6820_v15  ;;  %6213 = vmatprep.subr.mxu1 %v6549_v0  ;;  %v3949_v44 = vld [vmem:[%s7155_s3] sm:$0xff] }
 0x1a4   : > { %6190 = vmatprep.mubr.msk.f32.mxu0 %vm6550_vm0, %v6549_v0  ;;  %6214 = vmatpush3.msra.mxu1 %v6820_v15  ;;  %v2667_v49 = vand.u32 4294901760, %v2666_v47 }
 0x1a5   : > { %6461 = vpow2.f32 %v2131_v48  ;;  %6215 = vmatprep.mubr.msk.f32.mxu1 %vm6550_vm0, %v6549_v0  ;;  %6198 = vmatprep.subr.mxu0 %v6549_v0 }
 0x1a6   : > { %v6460_v52 = vpop.eup %6459  ;;  %6191 = vmatmul.mubr.f32.vlgmr.msra.gmra.mxu0 %v2667_v49  ;;  %6216 = vmatmul.mubr.f32.vlgmr.msra.gmra.mxu1 %v2663_v38 }
 0x1a7   : > { %6199 = vmatpush3.msra.mxu0 %v6823_v18  ;;  %6223 = vmatprep.subr.mxu1 %v6549_v0  ;;  %v2139_v53 = vsel %vm300_vm1, %v6460_v52, 0.0  ;;  %v3044_v54 = vsel %vm300_vm1, %v6460_v52, 0 }
 0x1a8   : > { %2140 = vadd.xlane.f32.xlu0 %v2139_v53  ;;  %6200 = vmatprep.mubr.msk.f32.mxu0 %vm6550_vm0, %v6549_v0  ;;  %v3112_v55 = vand.u32 4294901760, %v3044_v54 }
 0x1a9   : > { %6224 = vmatpush3.msra.mxu1 %v3157_v50  ;;  %6225 = vmatprep.mubr.msk.f32.mxu1 %vm6550_vm0, %v6549_v0  ;;  %v6967_v50 = vand.u32 4294901760, %v3949_v44 }
 0x1aa   : > { %6201 = vmatmul.mubr.f32.vlgmr.msra.gmra.mxu0 %v2664_v40  ;;  %6208 = vmatprep.subr.mxu0 %v6549_v0  ;;  %v3113_v57 = vsub.f32 %v3044_v54, %v3112_v55 }
 0x1ab   : > { %6226 = vmatmul.mubr.f32.vlgmr.msra.gmra.mxu1 %v3112_v55  ;;  %6209 = vmatpush3.msra.mxu0 %v2706_v22 }
 0x1ac   : > { %6233 = vmatprep.subr.mxu1 %v6549_v0  ;;  %6210 = vmatprep.mubr.msk.f32.mxu0 %vm6550_vm0, %v6549_v0  ;;  %v3114_v58 = vand.u32 4294901760, %v3113_v57 }
 0x1ad   : > { %6234 = vmatpush3.msra.mxu1 %v6835_v29  ;;  %6235 = vmatprep.mubr.msk.f32.mxu1 %vm6550_vm0, %v6549_v0 }
 0x1ae   : > { %6211 = vmatmul.mubr.f32.vlgmr.msra.gmra.mxu0 %v2663_v38  ;;  %6218 = vmatprep.subr.mxu0 %v6549_v0  ;;  %v3115_v60 = vsub.f32 %v3113_v57, %v3114_v58 }
 0x1af   : > { %6236 = vmatmul.mubr.f32.vlgmr.msra.gmra.mxu1 %v3114_v58  ;;  %6243 = vmatprep.subr.mxu1 %v6549_v0 }
 0x1b0   : > { %6219 = vmatpush3.msra.mxu0 %v6835_v29  ;;  %6220 = vmatprep.mubr.msk.f32.mxu0 %vm6550_vm0, %v6549_v0  ;;  %v3116_v61 = vand.u32 4294901760, %v3115_v60  ;;  %v6970_v60 = vsub.f32 %v3949_v44, %v6967_v50 }
 0x1b1   : > { %6244 = vmatpush3.msra.mxu1 %v6835_v29  ;;  %6245 = vmatprep.mubr.msk.f32.mxu1 %vm6550_vm0, %v6549_v0 }
 0x1b2   : > { %v6462_v63 = vpop.eup %6461  ;;  %6221 = vmatmul.mubr.f32.vlgmr.msra.gmra.mxu0 %v3116_v61  ;;  %6228 = vmatprep.subr.mxu0 %v6549_v0 }
 0x1b3   : > { %6246 = vmatmul.mubr.f32.vlgmr.msra.gmra.mxu1 %v3112_v55  ;;  %6253 = vmatprep.subr.mxu1 %v6549_v0  ;;  %v2142_v1 = vsel %vm300_vm1, %v6462_v63, 0.0  ;;  %v3493_v2 = vsel %vm300_vm1, %v6462_v63, 0 }
 0x1b4   : > { %2143 = vadd.xlane.f32.xlu1 %v2142_v1  ;;  %6229 = vmatpush3.msra.mxu0 %v6841_v34  ;;  %v3561_v3 = vand.u32 4294901760, %v3493_v2 }
 0x1b5   : > { %6230 = vmatprep.mubr.msk.f32.mxu0 %vm6550_vm0, %v6549_v0  ;;  %6254 = vmatpush3.msra.mxu1 %v3606_v62 }
 0x1b6   : > { %6255 = vmatprep.mubr.msk.f32.mxu1 %vm6550_vm0, %v6549_v0  ;;  %6231 = vmatmul.mubr.f32.vlgmr.msra.gmra.mxu0 %v3113_v57  ;;  %v3562_v4 = vsub.f32 %v3493_v2, %v3561_v3 }
 0x1b7   : > { %6256 = vmatmul.mubr.f32.vlgmr.msra.gmra.mxu1 %v3561_v3  ;;  %6238 = vmatprep.subr.mxu0 %v6549_v0 }
 0x1b8   : > { %6263 = vmatprep.subr.mxu1 %v6549_v0  ;;  %6239 = vmatpush3.msra.mxu0 %v3155_v39  ;;  %v3563_v5 = vand.u32 4294901760, %v3562_v4 }
 0x1b9   : > { %6240 = vmatprep.mubr.msk.f32.mxu0 %vm6550_vm0, %v6549_v0  ;;  %6264 = vmatpush3.msra.mxu1 %v6866_v46 }
 0x1ba   : > { %6265 = vmatprep.mubr.msk.f32.mxu1 %vm6550_vm0, %v6549_v0  ;;  %6241 = vmatmul.mubr.f32.vlgmr.msra.gmra.mxu0 %v3112_v55  ;;  %v3564_v6 = vsub.f32 %v3562_v4, %v3563_v5 }
 0x1bb   : > { %6266 = vmatmul.mubr.f32.vlgmr.msra.gmra.mxu1 %v3563_v5  ;;  %6248 = vmatprep.subr.mxu0 %v6549_v0 }
 0x1bc   : > { %6273 = vmatprep.subr.mxu1 %v6549_v0  ;;  %6249 = vmatpush3.msra.mxu0 %v6866_v46  ;;  %v3565_v7 = vand.u32 4294901760, %v3564_v6 }
 0x1bd   : > { %6250 = vmatprep.mubr.msk.f32.mxu0 %vm6550_vm0, %v6549_v0  ;;  %6274 = vmatpush3.msra.mxu1 %v6866_v46 }
 0x1be   : > { %6275 = vmatprep.mubr.msk.f32.mxu1 %vm6550_vm0, %v6549_v0  ;;  %6251 = vmatmul.mubr.f32.vlgmr.msra.gmra.mxu0 %v3565_v7  ;;  %v4514_v7 = vand.u32 4294901760, %v6970_v60 }
 0x1bf   : > { %6276 = vmatmul.mubr.f32.vlgmr.msra.gmra.mxu1 %v3561_v3  ;;  %6258 = vmatprep.subr.mxu0 %v6549_v0 }
 0x1c0   : > { %6259 = vmatpush3.msra.mxu0 %v6877_v51  ;;  %6260 = vmatprep.mubr.msk.f32.mxu0 %vm6550_vm0, %v6549_v0 }
 0x1c1   : > { %6268 = vmatprep.subr.mxu0 %v6549_v0  ;;  %6283 = vmatprep.subr.mxu1 %v6549_v0 }
 0x1c2   : > { %6261 = vmatmul.mubr.f32.vlgmr.msra.gmra.mxu0 %v3562_v4  ;;  %6285 = vmatprep.mubr.msk.f32.mxu1 %vm6550_vm0, %v6549_v0 }
 0x1c3   : > { %6269 = vmatpush3.msra.mxu0 %v3604_v56  ;;  %6270 = vmatprep.mubr.msk.f32.mxu0 %vm6550_vm0, %v6549_v0 }
 0x1c4   : > { %6278 = vmatprep.subr.mxu0 %v6549_v0  ;;  %6284 = vmatpush3.msra.mxu1 %v4067_v14 }
 0x1c5   : > { %6293 = vmatprep.subr.mxu1 %v6549_v0 }
 0x1c6   : > { %6271 = vmatmul.mubr.f32.vlgmr.msra.gmra.mxu0 %v3561_v3 }
 0x1c7   : > { %6280 = vmatprep.mubr.msk.f32.mxu0 %vm6550_vm0, %v6549_v0  ;;  %6279 = vmatpush3.msra.mxu0 %v6952_v10 }
 0x1c8   : > { %6288 = vmatprep.subr.mxu0 %v6549_v0 }
 0x219   : > { %v2135_v26 = vpop.xlane.xlu1 %2134 }
 0x21a   : > { %6463 = vrcp.f32 %v2135_v26 }
 0x225   : > { %v2138_v27 = vpop.xlane.xlu0 %2137 }
 0x226   : > { %6465 = vrcp.f32 %v2138_v27 }
 0x227   : > { %v6464_v55 = vpop.eup %6463 }
 0x231   : > { %v2141_v48 = vpop.xlane.xlu0 %2140 }
 0x232   : > { %6467 = vrcp.f32 %v2141_v48 }
 0x233   : > { %v6466_v58 = vpop.eup %6465 }
 0x252   : > { %v2296_v15 = vpop.f32.mrf.mxu1 }
 0x254   : > { %v6167_v16 = vpop.f32.mrf.mxu1 }
 0x256   : > { %v2444_v17 = vpop.f32.mrf.mxu1 }
 0x258   : > { %v6177_v18 = vpop.f32.mrf.mxu1 }
 0x25a   : > { %v2220_v19 = vpop.f32.mrf.mxu0  ;;  %v2590_v20 = vpop.f32.mrf.mxu1 }
 0x25b   : > { %v2297_v28 = vadd.f32 %v2296_v15, %v2220_v19  ;;  %v3951_v15 = vld [vmem:[%s7155_s3 + $0x10] sm:$0xff] }
 0x25c   : > { %v6162_v21 = vpop.f32.mrf.mxu0  ;;  %v6187_v9 = vpop.f32.mrf.mxu1 }
 0x25e   : > { %v2370_v22 = vpop.f32.mrf.mxu0  ;;  %v2745_v23 = vpop.f32.mrf.mxu1 }
 0x25f   : > { %v2371_v31 = vadd.f32 %v2370_v22, %v2297_v28 }
 0x260   : > { %v6172_v24 = vpop.f32.mrf.mxu0  ;;  %v6197_v25 = vpop.f32.mrf.mxu1 }
 0x261   : > { %v2445_v36 = vadd.f32 %v2444_v17, %v2371_v31  ;;  %v6991_v24 = vand.u32 4294901760, %v3951_v15  ;;  %v6468_v31 = vpop.eup %6467 }
 0x262   : > { %v2518_v29 = vpop.f32.mrf.mxu0  ;;  %v2893_v30 = vpop.f32.mrf.mxu1 }
 0x263   : > { %v2519_v41 = vadd.f32 %v2518_v29, %v2445_v36  ;;  %v7001_v36 = vsub.f32 %v3951_v15, %v6991_v24 }
 0x264   : > { %v6182_v32 = vpop.f32.mrf.mxu0  ;;  %v6207_v33 = vpop.f32.mrf.mxu1 }
 0x265   : > { %v2591_v51 = vadd.f32 %v2590_v20, %v2519_v41  ;;  %v2144_v20 = vpop.xlane.xlu1 %2143 }
 0x266   : > { %v2669_v34 = vpop.f32.mrf.mxu0  ;;  %v3039_v35 = vpop.f32.mrf.mxu1  ;;  %6469 = vrcp.f32 %v2144_v20 }
 0x267   : > { %v2746_v39 = vadd.f32 %v2745_v23, %v2669_v34  ;;  %v3945_v61 = vmul.f32 %v6464_v55, %v2591_v51  ;;  %v4515_v23 = vsub.f32 %v6970_v60, %v4514_v7 }
 0x268   : > { %v6192_v37 = vpop.f32.mrf.mxu0  ;;  %v6217_v38 = vpop.f32.mrf.mxu1 }
 0x269   : > { %v4403_v8 = vsel %vm300_vm1, %v3945_v61, 0 }
 0x26a   : > { %v2819_v40 = vpop.f32.mrf.mxu0  ;;  %v6985_v21 = vand.u32 4294901760, %v4403_v8 }
 0x26b   : > { %v2820_v42 = vadd.f32 %v2819_v40, %v2746_v39  ;;  %v3194_v43 = vpop.f32.mrf.mxu1 }
 0x26c   : > { %v6202_v45 = vpop.f32.mrf.mxu0  ;;  %v6997_v32 = vsub.f32 %v4403_v8, %v6985_v21 }
 0x26d   : > { %v6227_v46 = vpop.f32.mrf.mxu1  ;;  %v2894_v47 = vadd.f32 %v2893_v30, %v2820_v42 }
 0x26e   : > { %v2967_v49 = vpop.f32.mrf.mxu0  ;;  %v4473_v42 = vand.u32 4294901760, %v6997_v32  ;;  %v3952_v46 = vld [vmem:[%s7155_s3 + $0x18] sm:$0xff] }
 0x26f   : > { %v2968_v52 = vadd.f32 %v2967_v49, %v2894_v47  ;;  %v3342_v53 = vpop.f32.mrf.mxu1 }
 0x270   : > { %v6212_v54 = vpop.f32.mrf.mxu0 }
 0x271   : > { %v3040_v56 = vadd.f32 %v3039_v35, %v2968_v52  ;;  %v6237_v57 = vpop.f32.mrf.mxu1  ;;  %v4516_v35 = vand.u32 4294901760, %v4515_v23  ;;  %v4474_v52 = vsub.f32 %v6997_v32, %v4473_v42 }
 0x272   : > { %v3118_v59 = vpop.f32.mrf.mxu0 }
 0x273   : > { %v3946_v62 = vmul.f32 %v6466_v58, %v3040_v56  ;;  %v3488_v63 = vpop.f32.mrf.mxu1  ;;  %v3195_v3 = vadd.f32 %v3194_v43, %v3118_v59  ;;  %v4963_v43 = vand.u32 4294901760, %v7001_v36  ;;  %v6470_v56 = vpop.eup %6469  ;;  %v4475_v58 = vand.u32 4294901760, %v4474_v52 }
 0x274   : > { %v6222_v1 = vpop.f32.mrf.mxu0 }
 0x275   : > { %v3954_v2 = vsel %vm300_vm1, %v3946_v62, 0  ;;  %v6247_v4 = vpop.f32.mrf.mxu1 }
 0x276   : > { %v6973_v5 = vand.u32 4294901760, %v3954_v2  ;;  %v3268_v6 = vpop.f32.mrf.mxu0 }
 0x277   : > { %v3269_v13 = vadd.f32 %v3268_v6, %v3195_v3  ;;  %v3643_v14 = vpop.f32.mrf.mxu1 }
 0x278   : > { %v4023_v16 = vsub.f32 %v3954_v2, %v6973_v5  ;;  %v6232_v17 = vpop.f32.mrf.mxu0  ;;  %6286 = vmatmul.mubr.f32.vlgmr.msra.gmra.mxu1 %v6973_v5 }
 0x279   : > { %v6257_v18 = vpop.f32.mrf.mxu1  ;;  %v3343_v19 = vadd.f32 %v3342_v53, %v3269_v13  ;;  %6294 = vmatpush3.msra.mxu1 %v6952_v10  ;;  %6295 = vmatprep.mubr.msk.f32.mxu1 %vm6550_vm0, %v6549_v0  ;;  %v4964_v53 = vsub.f32 %v7001_v36, %v4963_v43 }
 0x27a   : > { %v3416_v9 = vpop.f32.mrf.mxu0  ;;  %v4024_v22 = vand.u32 4294901760, %v4023_v16  ;;  %6303 = vmatprep.subr.mxu1 %v6549_v0 }
 0x27b   : > { %v3417_v25 = vadd.f32 %v3416_v9, %v3343_v19  ;;  %v3791_v26 = vpop.f32.mrf.mxu1  ;;  %v4965_v59 = vand.u32 4294901760, %v4964_v53 }
 0x27c   : > { %v6242_v27 = vpop.f32.mrf.mxu0  ;;  %6296 = vmatmul.mubr.f32.vlgmr.msra.gmra.mxu1 %v4024_v22  ;;  %v4025_v28 = vsub.f32 %v4023_v16, %v4024_v22 }
 0x27d   : > { %v3489_v29 = vadd.f32 %v3488_v63, %v3417_v25  ;;  %v6267_v30 = vpop.f32.mrf.mxu1  ;;  %6304 = vmatpush3.msra.mxu1 %v6952_v10  ;;  %6305 = vmatprep.mubr.msk.f32.mxu1 %vm6550_vm0, %v6549_v0 }
 0x27e   : > { %v3567_v33 = vpop.f32.mrf.mxu0  ;;  %v4026_v34 = vand.u32 4294901760, %v4025_v28  ;;  %6313 = vmatprep.subr.mxu1 %v6549_v0 }
 0x27f   : > { %v3947_v37 = vmul.f32 %v6468_v31, %v3489_v29  ;;  %v3937_v38 = vpop.f32.mrf.mxu1  ;;  %v3644_v10 = vadd.f32 %v3643_v14, %v3567_v33 }
 0x280   : > { %v6252_v39 = vpop.f32.mrf.mxu0  ;;  %6281 = vmatmul.mubr.f32.vlgmr.msra.gmra.mxu0 %v4026_v34  ;;  %6306 = vmatmul.mubr.f32.vlgmr.msra.gmra.mxu1 %v6973_v5 }
 0x281   : > { %v6277_v40 = vpop.f32.mrf.mxu1  ;;  %6289 = vmatpush3.msra.mxu0 %v6955_v11  ;;  %6290 = vmatprep.mubr.msk.f32.mxu0 %vm6550_vm0, %v6549_v0  ;;  %v4852_v44 = vsel %vm300_vm1, %v3947_v37, 0  ;;  %v7031_v11 = vand.u32 4294901760, %v3952_v46 }
 0x282   : > { %v3717_v41 = vpop.f32.mrf.mxu0  ;;  %6314 = vmatpush3.msra.mxu1 %v4516_v35  ;;  %6315 = vmatprep.mubr.msk.f32.mxu1 %vm6550_vm0, %v6549_v0  ;;  %v7022_v49 = vand.u32 4294901760, %v4852_v44 }
 0x283   : > { %v3718_v45 = vadd.f32 %v3717_v41, %v3644_v10  ;;  %6298 = vmatprep.subr.mxu0 %v6549_v0  ;;  %6323 = vmatprep.subr.mxu1 %v6549_v0  ;;  %v7044_v61 = vsub.f32 %v3952_v46, %v7031_v11 }
 0x284   : > { %v6262_v47 = vpop.f32.mrf.mxu0  ;;  %6291 = vmatmul.mubr.f32.vlgmr.msra.gmra.mxu0 %v4023_v16  ;;  %6316 = vmatmul.mubr.f32.vlgmr.msra.gmra.mxu1 %v6985_v21  ;;  %v4921_v57 = vsub.f32 %v4852_v44, %v7022_v49 }
 0x285   : > { %6299 = vmatpush3.msra.mxu0 %v4065_v12  ;;  %v3792_v48 = vadd.f32 %v3791_v26, %v3718_v45  ;;  %6300 = vmatprep.mubr.msk.f32.mxu0 %vm6550_vm0, %v6549_v0  ;;  %v5413_v63 = vand.u32 4294901760, %v7044_v61 }
 0x286   : > { %v3865_v51 = vpop.f32.mrf.mxu0  ;;  %6324 = vmatpush3.msra.mxu1 %v6967_v50  ;;  %6325 = vmatprep.mubr.msk.f32.mxu1 %vm6550_vm0, %v6549_v0 }
 0x287   : > { %v3866_v12 = vadd.f32 %v3865_v51, %v3792_v48  ;;  %6308 = vmatprep.subr.mxu0 %v6549_v0  ;;  %6333 = vmatprep.subr.mxu1 %v6549_v0  ;;  %v5414_v4 = vsub.f32 %v7044_v61, %v5413_v63 }
 0x288   : > { %v6272_v54 = vpop.f32.mrf.mxu0  ;;  %6301 = vmatmul.mubr.f32.vlgmr.msra.gmra.mxu0 %v6973_v5  ;;  %6326 = vmatmul.mubr.f32.vlgmr.msra.gmra.mxu1 %v4473_v42 }
 0x289   : > { %v3938_v55 = vadd.f32 %v3937_v38, %v3866_v12  ;;  %6309 = vmatpush3.msra.mxu0 %v6967_v50  ;;  %6310 = vmatprep.mubr.msk.f32.mxu0 %vm6550_vm0, %v6549_v0  ;;  %v5415_v6 = vand.u32 4294901760, %v5414_v4 }
 0x28a   : > { %6334 = vmatpush3.msra.mxu1 %v6967_v50  ;;  %6335 = vmatprep.mubr.msk.f32.mxu1 %vm6550_vm0, %v6549_v0  ;;  %v4922_v50 = vand.u32 4294901760, %v4921_v57 }
 0x28b   : > { %v3948_v62 = vmul.f32 %v6470_v56, %v3938_v55  ;;  %6318 = vmatprep.subr.mxu0 %v6549_v0  ;;  %6343 = vmatprep.subr.mxu1 %v6549_v0 }
 0x28c   : > { %6311 = vmatmul.mubr.f32.vlgmr.msra.gmra.mxu0 %v4475_v58  ;;  %6336 = vmatmul.mubr.f32.vlgmr.msra.gmra.mxu1 %v6985_v21  ;;  %v4923_v3 = vsub.f32 %v4921_v57, %v4922_v50 }
 0x28d   : > { %6319 = vmatpush3.msra.mxu0 %v6970_v60  ;;  %6320 = vmatprep.mubr.msk.f32.mxu0 %vm6550_vm0, %v6549_v0  ;;  %v5302_v1 = vsel %vm300_vm1, %v3948_v62, 0 }
 0x28e   : > { %6344 = vmatpush3.msra.mxu1 %v4965_v59  ;;  %6345 = vmatprep.mubr.msk.f32.mxu1 %vm6550_vm0, %v6549_v0  ;;  %v5370_v2 = vand.u32 4294901760, %v5302_v1  ;;  %v4924_v5 = vand.u32 4294901760, %v4923_v3 }
 0x28f   : > { %6328 = vmatprep.subr.mxu0 %v6549_v0  ;;  %6353 = vmatprep.subr.mxu1 %v6549_v0 }
 0x290   : > { %6321 = vmatmul.mubr.f32.vlgmr.msra.gmra.mxu0 %v6997_v32  ;;  %6346 = vmatmul.mubr.f32.vlgmr.msra.gmra.mxu1 %v7022_v49  ;;  %v5371_v60 = vsub.f32 %v5302_v1, %v5370_v2 }
 0x291   : > { %6329 = vmatpush3.msra.mxu0 %v4514_v7  ;;  %6330 = vmatprep.mubr.msk.f32.mxu0 %vm6550_vm0, %v6549_v0 }
 0x292   : > { %6354 = vmatpush3.msra.mxu1 %v6991_v24  ;;  %6355 = vmatprep.mubr.msk.f32.mxu1 %vm6550_vm0, %v6549_v0  ;;  %v5372_v7 = vand.u32 4294901760, %v5371_v60 }
 0x293   : > { %6338 = vmatprep.subr.mxu0 %v6549_v0  ;;  %6363 = vmatprep.subr.mxu1 %v6549_v0 }
 0x294   : > { %6331 = vmatmul.mubr.f32.vlgmr.msra.gmra.mxu0 %v6985_v21  ;;  %6356 = vmatmul.mubr.f32.vlgmr.msra.gmra.mxu1 %v4922_v50  ;;  %v5373_v8 = vsub.f32 %v5371_v60, %v5372_v7 }
 0x295   : > { %6339 = vmatpush3.msra.mxu0 %v6991_v24  ;;  %6340 = vmatprep.mubr.msk.f32.mxu0 %vm6550_vm0, %v6549_v0 }
 0x296   : > { %6364 = vmatpush3.msra.mxu1 %v6991_v24  ;;  %6365 = vmatprep.mubr.msk.f32.mxu1 %vm6550_vm0, %v6549_v0  ;;  %v5374_v13 = vand.u32 4294901760, %v5373_v8 }
 0x297   : > { %6348 = vmatprep.subr.mxu0 %v6549_v0  ;;  %6373 = vmatprep.subr.mxu1 %v6549_v0 }
 0x298   : > { %6341 = vmatmul.mubr.f32.vlgmr.msra.gmra.mxu0 %v4924_v5  ;;  %6366 = vmatmul.mubr.f32.vlgmr.msra.gmra.mxu1 %v7022_v49 }
 0x299   : > { %6349 = vmatpush3.msra.mxu0 %v7001_v36  ;;  %6350 = vmatprep.mubr.msk.f32.mxu0 %vm6550_vm0, %v6549_v0 }
 0x29a   : > { %6374 = vmatpush3.msra.mxu1 %v5415_v6  ;;  %6375 = vmatprep.mubr.msk.f32.mxu1 %vm6550_vm0, %v6549_v0 }
 0x29b   : > { %6358 = vmatprep.subr.mxu0 %v6549_v0  ;;  %6383 = vmatprep.subr.mxu1 %v6549_v0 }
 0x29c   : > { %6351 = vmatmul.mubr.f32.vlgmr.msra.gmra.mxu0 %v4921_v57  ;;  %6376 = vmatmul.mubr.f32.vlgmr.msra.gmra.mxu1 %v5370_v2 }
 0x29d   : > { %6359 = vmatpush3.msra.mxu0 %v4963_v43  ;;  %6360 = vmatprep.mubr.msk.f32.mxu0 %vm6550_vm0, %v6549_v0 }
 0x29e   : > { %6384 = vmatpush3.msra.mxu1 %v7031_v11  ;;  %6385 = vmatprep.mubr.msk.f32.mxu1 %vm6550_vm0, %v6549_v0 }
 0x29f   : > { %6368 = vmatprep.subr.mxu0 %v6549_v0  ;;  %6393 = vmatprep.subr.mxu1 %v6549_v0 }
 0x2a0   : > { %6361 = vmatmul.mubr.f32.vlgmr.msra.gmra.mxu0 %v7022_v49  ;;  %6386 = vmatmul.mubr.f32.vlgmr.msra.gmra.mxu1 %v5372_v7 }
 0x2a1   : > { %6369 = vmatpush3.msra.mxu0 %v7031_v11  ;;  %6370 = vmatprep.mubr.msk.f32.mxu0 %vm6550_vm0, %v6549_v0 }
 0x2a2   : > { %6394 = vmatpush3.msra.mxu1 %v7031_v11  ;;  %6395 = vmatprep.mubr.msk.f32.mxu1 %vm6550_vm0, %v6549_v0 }
 0x2a3   : > { %6378 = vmatprep.subr.mxu0 %v6549_v0 }
 0x2a4   : > { %6371 = vmatmul.mubr.f32.vlgmr.msra.gmra.mxu0 %v5374_v13  ;;  %6396 = vmatmul.mubr.f32.vlgmr.msra.gmra.mxu1 %v5370_v2 }
 0x2a5   : > { %6379 = vmatpush3.msra.mxu0 %v7044_v61  ;;  %6380 = vmatprep.mubr.msk.f32.mxu0 %vm6550_vm0, %v6549_v0 }
 0x2a6   : > { %6388 = vmatprep.subr.mxu0 %v6549_v0 }
 0x2a8   : > { %6381 = vmatmul.mubr.f32.vlgmr.msra.gmra.mxu0 %v5371_v60 }
 0x2a9   : > { %6389 = vmatpush3.msra.mxu0 %v5413_v63  ;;  %6390 = vmatprep.mubr.msk.f32.mxu0 %vm6550_vm0, %v6549_v0 }
 0x2ac   : > { %6391 = vmatmul.mubr.f32.vlgmr.msra.gmra.mxu0 %v5370_v2 }
 0x338   : > { %v4104_v14 = vpop.f32.mrf.mxu1 }
 0x33a   : > { %v6287_v15 = vpop.f32.mrf.mxu1 }
 0x33c   : > { %v4252_v16 = vpop.f32.mrf.mxu1 }
 0x33e   : > { %v6297_v17 = vpop.f32.mrf.mxu1 }
 0x340   : > { %v4028_v18 = vpop.f32.mrf.mxu0  ;;  %v4398_v19 = vpop.f32.mrf.mxu1 }
 0x341   : > { %v4105_v25 = vadd.f32 %v4104_v14, %v4028_v18 }
 0x342   : > { %v6282_v20 = vpop.f32.mrf.mxu0  ;;  %v6307_v21 = vpop.f32.mrf.mxu1 }
 0x343   : > { %v5886_v20 = vld [vmem:[%s7156_s4] ss:$0 sm:$0xff] }
 0x344   : > { %v4178_v9 = vpop.f32.mrf.mxu0  ;;  %v4553_v22 = vpop.f32.mrf.mxu1 }
 0x345   : > { %v4179_v28 = vadd.f32 %v4178_v9, %v4105_v25 }
 0x346   : > { %v6292_v23 = vpop.f32.mrf.mxu0  ;;  %v6317_v24 = vpop.f32.mrf.mxu1 }
 0x347   : > { %v4253_v32 = vadd.f32 %v4252_v16, %v4179_v28 }
 0x348   : > { %v4326_v26 = vpop.f32.mrf.mxu0  ;;  %v4701_v27 = vpop.f32.mrf.mxu1 }
 0x349   : > { %v4327_v37 = vadd.f32 %v4326_v26, %v4253_v32 }
 0x34a   : > { %v6302_v29 = vpop.f32.mrf.mxu0  ;;  %v6327_v30 = vpop.f32.mrf.mxu1 }
 0x34b   : > { %v4399_v41 = vadd.f32 %v4398_v19, %v4327_v37 }
 0x34c   : > { %v4477_v0 = vpop.f32.mrf.mxu0  ;;  %v4847_v31 = vpop.f32.mrf.mxu1 }
 0x34d   : > { %v4478_v46 = vadd.f32 %v4477_v0, %v4399_v41 }
 0x34e   : > { %v6312_v33 = vpop.f32.mrf.mxu0  ;;  %v6337_v34 = vpop.f32.mrf.mxu1 }
 0x34f   : > { %v4554_v52 = vadd.f32 %v4553_v22, %v4478_v46 }
 0x350   : > { %v4627_v35 = vpop.f32.mrf.mxu0  ;;  %v5002_v36 = vpop.f32.mrf.mxu1 }
 0x351   : > { %v4628_v57 = vadd.f32 %v4627_v35, %v4554_v52 }
 0x352   : > { %v6322_v38 = vpop.f32.mrf.mxu0  ;;  %v6347_v39 = vpop.f32.mrf.mxu1 }
 0x353   : > { %v4702_v63 = vadd.f32 %v4701_v27, %v4628_v57 }
 0x354   : > { %v4775_v10 = vpop.f32.mrf.mxu0  ;;  %v5150_v40 = vpop.f32.mrf.mxu1 }
 0x355   : > { %v4776_v5 = vadd.f32 %v4775_v10, %v4702_v63 }
 0x356   : > { %v6332_v42 = vpop.f32.mrf.mxu0  ;;  %v6357_v43 = vpop.f32.mrf.mxu1 }
 0x357   : > { %v4848_v15 = vadd.f32 %v4847_v31, %v4776_v5 }
 0x358   : > { %v4926_v44 = vpop.f32.mrf.mxu0  ;;  %v5296_v45 = vpop.f32.mrf.mxu1 }
 0x359   : > { %v5003_v53 = vadd.f32 %v5002_v36, %v4926_v44 }
 0x35a   : > { %v6342_v47 = vpop.f32.mrf.mxu0  ;;  %v6367_v48 = vpop.f32.mrf.mxu1 }
 0x35c   : > { %v5076_v49 = vpop.f32.mrf.mxu0  ;;  %v5452_v51 = vpop.f32.mrf.mxu1 }
 0x35d   : > { %v5077_v54 = vadd.f32 %v5076_v49, %v5003_v53 }
 0x35e   : > { %v6352_v11 = vpop.f32.mrf.mxu0  ;;  %v6377_v12 = vpop.f32.mrf.mxu1 }
 0x35f   : > { %v5151_v61 = vadd.f32 %v5150_v40, %v5077_v54 }
 0x360   : > { %v5224_v55 = vpop.f32.mrf.mxu0  ;;  %v5600_v56 = vpop.f32.mrf.mxu1 }
 0x361   : > { %v5225_v3 = vadd.f32 %v5224_v55, %v5151_v61 }
 0x362   : > { %v6362_v58 = vpop.f32.mrf.mxu0  ;;  %v6387_v59 = vpop.f32.mrf.mxu1 }
 0x363   : > { %v5297_v8 = vadd.f32 %v5296_v45, %v5225_v3 }
 0x364   : > { %v5376_v62 = vpop.f32.mrf.mxu0  ;;  %v5746_v50 = vpop.f32.mrf.mxu1 }
 0x365   : > { %v5453_v4 = vadd.f32 %v5452_v51, %v5376_v62  ;;  %v5300_v18 = vadd.f32 %v5297_v8, %v4848_v15 }
 0x366   : > { %v6372_v1 = vpop.f32.mrf.mxu0  ;;  %v6397_v2 = vpop.f32.mrf.mxu1 }
 0x368   : > { %v5526_v60 = vpop.f32.mrf.mxu0 }
 0x369   : > { %v5527_v6 = vadd.f32 %v5526_v60, %v5453_v4 }
 0x36a   : > { %v6382_v7 = vpop.f32.mrf.mxu0 }
 0x36b   : > { %v5601_v13 = vadd.f32 %v5600_v56, %v5527_v6 }
 0x36c   : > { %v5674_v14 = vpop.f32.mrf.mxu0 }
 0x36d   : > { %v5675_v16 = vadd.f32 %v5674_v14, %v5601_v13 }
 0x36e   : > { %v6392_v17 = vpop.f32.mrf.mxu0 }
 0x36f   : > { %v5747_v19 = vadd.f32 %v5746_v50, %v5675_v16 }
 0x371   : > { %v5750_v21 = vadd.f32 %v5747_v19, %v5300_v18 }
 0x373   : > { %v5758_v9 = vadd.f32 %v5886_v20, %v5750_v21 }
 0x375   : > { %5760 = vst.msk [vmem:[%s269_s16] sm:$0xff] %vm5759_vm2, %v5758_v9 }
 0x376   : > { %6484 = shalt.err (!%p6481_p5)
}
 0x377   : > { %s6485_s10 = scalar_lea.hbm %s5774_s27, 128  ;;  %s6489_s13 = scalar_lea.hbm %s7157_s5, 256 }
 0x378   : > { %p6486_p6 = scmp.ne.s32.totalorder %s5774_s27, %s6485_s10  ;;  %p6490_p10 = scmp.lt.s32.totalorder %s5774_s27, %s7157_s5 }
 0x379   : > { %p6491_p11 = scmp.lt.s32.totalorder %s6489_s13, %s6485_s10 }
 0x37a   : > { %p6487_p7 = pnand %p6486_p6, %p6622_p4 }
 0x37b   : > { %p6492_p12 = por %p6491_p11, %p6490_p10 }
 0x37c   : > { %p6488_p9 = pneg %p6487_p7 }
 0x37e   : > { %p6493_p13 = pnand %p6492_p12, %p6488_p9 }
 0x380   : > { %6496 = shalt.err (!%p6493_p13)
}
 0x381   : > { %6398 = dma.vmem_to_hbm [thread:$0]  (%p6622_p4), %s5777_s17, 128, %s5774_s27, %s5762_s29  }
 0x382 PF: > { %p6404_p0 = scmp.ge.s32.totalorder %s6547_s23, 2  ;;  %s5788_s16 = sand.u32 1, %s6527_s18  }
 0x383   : > { %s5789_s24 = scalar_lea.sflag [#allocation3], %s5788_s16 }
 0x384   : > { %p6401_p1 = pnand %p6404_p0, %p6629_p8 }
 0x386   : > { %p6402_p2 = pneg %p6401_p1 }
 0x388   : > { %6522 = dma.done.wait (%p6402_p2), %s5789_s24, 128  }
 0x389   : > { %6524 = vsyncadd (%p6402_p2), %s5789_s24, 4294967168  ;;  %s18_s23 = sadd.s32 1, %s6547_s23   ;;  %s7160_s18 = smov %s6531_s19 }
 0x38a   : > { %p15_p3 = scmp.ge.s32.totalorder %s18_s23, 4   ;;  %s7161_s19 = smov %s6535_s20 }
 0x38b   : > { %s7162_s20 = smov %s6635_s6  ;;  %s7163_s21 = smov %s6543_s22 }
 0x38c   : > { %s7164_s22 = smov %s7166_s26  ;;  %17 = sbr.rel (!%p15_p3) target bundleno = 4 (0x4), region = 81 }
 0x391   :  { %5794 = vsyncpa [#allocation3], 1 }
 0x392   :  { %5796 = vsyncpa [#allocation3 + $0x1], 1 }

</bundles_post_ra>
